<compile_context>
chip_gen: v7x
topology: tpu7x:2x2x1
jax: 0.10.0
libtpu: 0.0.40
codegen_flags: <defaults>
</compile_context>

<pallas_src>
import functools

import jax
import jax.numpy as jnp
from jax.experimental import pallas as pl
from jax.experimental.pallas import tpu as pltpu


# ------------------------------ fused kernel --------------------------------
def _tsn_fused_kernel(patch_ref, cw_ref, cb_ref, pool_ref, fw_ref, fb_ref,
                      out_ref):
    # patch_ref: (M, K)       bf16  im2col patches of G videos (M = G*T*H*W)
    # cw_ref   : (K, CoutP)   bf16  conv weight, Cout zero-padded to 128 lanes
    # cb_ref   : (1, CoutP)   f32   conv bias (zero-padded)
    # pool_ref : (G, M)       f32   block-diag averaging matrix: GAP * consensus
    # fw_ref   : (CoutP,ClsP) f32   fc weight (rows/cols zero-padded)
    # fb_ref   : (1, ClsP)    f32   fc bias   (zero-padded)
    # out_ref  : (G, 1, ClsP) f32   per-video consensus class scores
    g = out_ref.shape[0]
    clsp = out_ref.shape[2]

    # backbone: conv as ONE im2col matmul (bf16 MXU, f32 acc) + bias + ReLU,
    # all on lane-dense 128-wide vregs.
    y = jnp.dot(patch_ref[...], cw_ref[...],
                preferred_element_type=jnp.float32)              # (M, CoutP)
    y = jnp.maximum(y + cb_ref[...], 0.0)

    # GAP over H*W and TSN segment-consensus mean over T, fused into a single
    # MXU matmul (the head fc is affine, so the means commute with it).
    feat = jnp.dot(pool_ref[...], y,
                   preferred_element_type=jnp.float32)           # (G, CoutP)

    # head: fc.  TODO(synk): training-mode dropout in the TSN head is identity
    # at inference and is omitted.
    out = jnp.dot(feat, fw_ref[...],
                  preferred_element_type=jnp.float32) + fb_ref[...]   # (G, ClsP)
    out_ref[...] = out.reshape(g, 1, clsp).astype(out_ref.dtype)


# -------------------------------- wrapper ------------------------------------
def _videos_per_step(n_videos, bytes_per_video, budget_bytes):
    """Largest divisor of N that fits the VMEM budget; keep >=2 grid steps
    (so both v7x TensorCores get work) whenever N >= 2."""
    best = 1
    for g in range(1, n_videos + 1):
        if n_videos % g:
            continue
        if g * bytes_per_video > budget_bytes:
            continue
        if n_videos >= 2 and n_videos // g < 2:
            continue
        best = g
    return best


@functools.partial(jax.jit, static_argnames=("num_segments",))
def tsn_recognizer_forward(imgs_nchw, conv_w, conv_b, fc_w, fc_b, *, num_segments):
    """imgs_nchw: (N*T, C, H, W) float32 — matches the PyTorch module input.

    NOTE: the (N*T) batch must be video-major (all T segments of a video
    contiguous), exactly as the PyTorch TSN pipeline supplies it; otherwise
    the per-video consensus would mix videos.
    """
    NT, Cin, H, W = imgs_nchw.shape
    KH, KW, _, Cout = conv_w.shape
    num_classes = fc_w.shape[1]
    assert NT % num_segments == 0, "batch must fold N*T with T=num_segments"
    T = num_segments
    N = NT // T
    HW = H * W
    K = KH * KW * Cin
    COUT_P = ((Cout + 127) // 128) * 128          # lane-dense channel axis
    CLS_P = ((num_classes + 127) // 128) * 128    # lane-dense class axis

    # ---- wrapper-side im2col: kernel becomes pure matmul + epilogue --------
    ph0, pw0 = (KH - 1) // 2, (KW - 1) // 2
    ph1, pw1 = KH - 1 - ph0, KW - 1 - pw0
    x = jnp.transpose(imgs_nchw, (0, 2, 3, 1))                     # NHWC
    x = jnp.pad(x, ((0, 0), (ph0, ph1), (pw0, pw1), (0, 0)))
    taps = [x[:, dh:dh + H, dw:dw + W, :]
            for dh in range(KH) for dw in range(KW)]               # (dh,dw,cin) order
    patch = jnp.concatenate(taps, axis=-1)                         # (NT, H, W, K)
    # bf16 activations: halves HBM->VMEM DMA and the in-kernel footprint.
    patch = patch.reshape(NT * HW, K).astype(jnp.bfloat16)

    # conv weight/bias with Cout zero-padded to 128 lanes (exact zeros flow
    # through ReLU/GAP/fc, so numerics are unchanged).
    cw = jnp.pad(conv_w.reshape(K, Cout),
                 ((0, 0), (0, COUT_P - Cout))).astype(jnp.bfloat16)
    cb = jnp.pad(conv_b.astype(jnp.float32),
                 (0, COUT_P - Cout)).reshape(1, COUT_P)

    # fc weight/bias, rows padded to the padded channel axis, cols to 128.
    fw = jnp.pad(fc_w.astype(jnp.float32),
                 ((0, COUT_P - Cout), (0, CLS_P - num_classes)))
    fb = jnp.pad(fc_b.astype(jnp.float32),
                 (0, CLS_P - num_classes)).reshape(1, CLS_P)

    # ---- videos per grid step (generation-aware VMEM budgeting) ------------
    per_video_bytes = (T * HW * K * 2 * 2          # patch block, double-buffered bf16
                       + T * HW * COUT_P * 4)      # f32 conv activation intermediate
    G = _videos_per_step(N, per_video_bytes, budget_bytes=24 * 1024 * 1024)
    M = G * T * HW

    # Block-diagonal averaging matrix: fuses GAP (1/(H*W)) and the TSN
    # consensus mean (1/T) into one (G, M) operand for a single MXU matmul.
    seg = jnp.arange(M, dtype=jnp.int32) // (T * HW)
    pool = (seg[None, :] == jnp.arange(G, dtype=jnp.int32)[:, None])
    pool = pool.astype(jnp.float32) * (1.0 / float(T * HW))

    vmem_est = (G * per_video_bytes                 # patch blocks + y intermediate
                + G * M * 4                         # pooling matrix
                + K * COUT_P * 2 + COUT_P * 4       # conv weights/bias
                + COUT_P * CLS_P * 4 + CLS_P * 4    # fc weights/bias
                + 2 * G * CLS_P * 4)                # output block (double-buffered)
    vmem_limit = int(min(48 * 1024 * 1024, max(16 * 1024 * 1024, 2 * vmem_est)))

    out_padded = pl.pallas_call(
        _tsn_fused_kernel,
        out_shape=jax.ShapeDtypeStruct((N, 1, CLS_P), jnp.float32),
        grid_spec=pltpu.PrefetchScalarGridSpec(
            num_scalar_prefetch=0,
            grid=(N // G,),                         # >=2 steps when N >= 2 (v7x)
            in_specs=[
                pl.BlockSpec((M, K), lambda n: (n, 0)),
                pl.BlockSpec((K, COUT_P), lambda n: (0, 0)),
                pl.BlockSpec((1, COUT_P), lambda n: (0, 0)),
                pl.BlockSpec((G, M), lambda n: (0, 0)),
                pl.BlockSpec((COUT_P, CLS_P), lambda n: (0, 0)),
                pl.BlockSpec((1, CLS_P), lambda n: (0, 0)),
            ],
            out_specs=pl.BlockSpec((G, 1, CLS_P), lambda n: (n, 0, 0)),
        ),
        compiler_params=pltpu.CompilerParams(
            dimension_semantics=("parallel",),
            vmem_limit_bytes=vmem_limit,
        ),
    )(patch, cw, cb, pool, fw, fb)

    return out_padded[:, 0, :num_classes]


# ----------------------------- pure-JAX reference ----------------------------
def _reference(imgs_nchw, conv_w, conv_b, fc_w, fc_b, num_segments):
    x = jnp.transpose(imgs_nchw, (0, 2, 3, 1))                    # NHWC
    y = jax.lax.conv_general_dilated(
        x, conv_w, window_strides=(1, 1), padding="SAME",
        dimension_numbers=("NHWC", "HWIO", "NHWC"))
    y = jnp.maximum(y + conv_b[None, None, None, :], 0.0)
    feats = jnp.mean(y, axis=(1, 2))                               # (NT, Cout)
    logits = feats @ fc_w + fc_b[None, :]                          # (NT, C)
    N = imgs_nchw.shape[0] // num_segments
    return jnp.mean(logits.reshape(N, num_segments, -1), axis=1)   # (N, C)


if __name__ == "__main__":
    # small, deterministic problem: N=2 videos, T=8 segments, 4x16x16 frames
    N, T, Cin, H, W = 2, 8, 4, 16, 16
    Cout, num_classes = 32, 10
    NT = N * T

    key = jax.random.PRNGKey(0)
    k_img, k_cw, k_cb, k_fw, k_fb = jax.random.split(key, 5)

    imgs = jax.random.normal(k_img, (NT, Cin, H, W), jnp.float32)   # NCHW
    conv_w = jax.random.normal(k_cw, (3, 3, Cin, Cout), jnp.float32) * 0.1
    conv_b = jax.random.normal(k_cb, (Cout,), jnp.float32) * 0.1
    fc_w = jax.random.normal(k_fw, (Cout, num_classes), jnp.float32) * 0.1
    fc_b = jax.random.normal(k_fb, (num_classes,), jnp.float32) * 0.1

    out = tsn_recognizer_forward(imgs, conv_w, conv_b, fc_w, fc_b,
                                 num_segments=T)
    out = jax.block_until_ready(out)

    ref = _reference(imgs, conv_w, conv_b, fc_w, fc_b, T)
    assert out.shape == (N, num_classes)
    # conv matmul uses bf16 activations/weights on the MXU (f32 accumulation)
    # -> slightly looser tolerance than a pure-f32 path.
    assert jnp.allclose(out, ref, rtol=2e-2, atol=2e-3), "mismatch vs reference"

    print("KERNEL_OK")
</pallas_src>

<mosaic_0001>
module attributes {stable_mosaic.version = 11 : i64} {
  func.func @_tsn_fused_kernel(%arg0: i32, %arg1: memref<2048x36xbf16, #tpu.memory_space<vmem>>, %arg2: memref<36x128xbf16, #tpu.memory_space<vmem>>, %arg3: memref<1x128xf32, #tpu.memory_space<vmem>>, %arg4: memref<1x2048xf32, #tpu.memory_space<vmem>>, %arg5: memref<128x128xf32, #tpu.memory_space<vmem>>, %arg6: memref<1x128xf32, #tpu.memory_space<vmem>>, %arg7: memref<1x1x128xf32, #tpu.memory_space<vmem>>) attributes {dimension_semantics = [#tpu.dimension_semantics<parallel>], iteration_bounds = array<i64: 2>, scalar_prefetch = 0 : i64, scratch_operands = 0 : i64, tpu.core_type = #tpu.core_type<tc>, window_params = [{transform_indices = @transform_0, window_bounds = array<i64: 2048, 36>}, {pipeline_mode = #tpu.pipeline_mode<synchronous>, transform_indices = @transform_1, window_bounds = array<i64: 36, 128>}, {pipeline_mode = #tpu.pipeline_mode<synchronous>, transform_indices = @transform_2, window_bounds = array<i64: 1, 128>}, {pipeline_mode = #tpu.pipeline_mode<synchronous>, transform_indices = @transform_3, window_bounds = array<i64: 1, 2048>}, {pipeline_mode = #tpu.pipeline_mode<synchronous>, transform_indices = @transform_4, window_bounds = array<i64: 128, 128>}, {pipeline_mode = #tpu.pipeline_mode<synchronous>, transform_indices = @transform_5, window_bounds = array<i64: 1, 128>}, {transform_indices = @transform_6, window_bounds = array<i64: 1, 1, 128>}]} {
    %c0 = arith.constant 0 : index
    %c0_0 = arith.constant 0 : index
    %0 = vector.load %arg1[%c0, %c0_0] : memref<2048x36xbf16, #tpu.memory_space<vmem>>, vector<2048x36xbf16>
    %c0_1 = arith.constant 0 : index
    %c0_2 = arith.constant 0 : index
    %1 = vector.load %arg2[%c0_1, %c0_2] : memref<36x128xbf16, #tpu.memory_space<vmem>>, vector<36x128xbf16>
    %cst = arith.constant dense<0.000000e+00> : vector<2048x128xf32>
    %2 = tpu.matmul %0, %1, %cst {dimension_numbers = #tpu.dot_dimension_numbers<[1], [0], [0], [1], [0, 0, 1, 1], [], []>} : vector<2048x36xbf16>, vector<36x128xbf16>, vector<2048x128xf32> -> vector<2048x128xf32>
    %c0_3 = arith.constant 0 : index
    %c0_4 = arith.constant 0 : index
    %3 = vector.load %arg3[%c0_3, %c0_4] : memref<1x128xf32, #tpu.memory_space<vmem>>, vector<1x128xf32>
    %4 = vector.broadcast %3 : vector<1x128xf32> to vector<2048x128xf32>
    %5 = arith.addf %2, %4 : vector<2048x128xf32>
    %cst_5 = arith.constant 0.000000e+00 : f32
    %6 = vector.broadcast %cst_5 : f32 to vector<2048x128xf32>
    %7 = arith.maximumf %5, %6 : vector<2048x128xf32>
    %c0_6 = arith.constant 0 : index
    %c0_7 = arith.constant 0 : index
    %8 = vector.load %arg4[%c0_6, %c0_7] : memref<1x2048xf32, #tpu.memory_space<vmem>>, vector<1x2048xf32>
    %cst_8 = arith.constant dense<0.000000e+00> : vector<1x128xf32>
    %9 = tpu.matmul %8, %7, %cst_8 {dimension_numbers = #tpu.dot_dimension_numbers<[1], [0], [0], [1], [0, 0, 1, 1], [], []>} : vector<1x2048xf32>, vector<2048x128xf32>, vector<1x128xf32> -> vector<1x128xf32>
    %c0_9 = arith.constant 0 : index
    %c0_10 = arith.constant 0 : index
    %10 = vector.load %arg5[%c0_9, %c0_10] : memref<128x128xf32, #tpu.memory_space<vmem>>, vector<128x128xf32>
    %cst_11 = arith.constant dense<0.000000e+00> : vector<1x128xf32>
    %11 = tpu.matmul %9, %10, %cst_11 {dimension_numbers = #tpu.dot_dimension_numbers<[1], [0], [0], [1], [0, 0, 1, 1], [], []>} : vector<1x128xf32>, vector<128x128xf32>, vector<1x128xf32> -> vector<1x128xf32>
    %c0_12 = arith.constant 0 : index
    %c0_13 = arith.constant 0 : index
    %12 = vector.load %arg6[%c0_12, %c0_13] : memref<1x128xf32, #tpu.memory_space<vmem>>, vector<1x128xf32>
    %13 = arith.addf %11, %12 : vector<1x128xf32>
    %14 = vector.shape_cast %13 : vector<1x128xf32> to vector<1x1x128xf32>
    %c0_14 = arith.constant 0 : index
    %c0_15 = arith.constant 0 : index
    %c0_16 = arith.constant 0 : index
    %15 = vector.load %arg7[%c0_14, %c0_15, %c0_16] : memref<1x1x128xf32, #tpu.memory_space<vmem>>, vector<1x1x128xf32>
    tpu.vector_store %arg7[%c0_14, %c0_15, %c0_16], %14 {strides = array<i32>} : memref<1x1x128xf32, #tpu.memory_space<vmem>>, vector<1x1x128xf32>,
    return
  }
  func.func @transform_0(%arg0: i32) -> (i32, i32) {
    %c0_i32 = arith.constant 0 : i32
    %c0_i32_0 = arith.constant 0 : i32
    return %arg0, %c0_i32 : i32, i32
  }
  func.func @transform_1(%arg0: i32) -> (i32, i32) {
    %c0_i32 = arith.constant 0 : i32
    %c0_i32_0 = arith.constant 0 : i32
    %c0_i32_1 = arith.constant 0 : i32
    return %c0_i32, %c0_i32_0 : i32, i32
  }
  func.func @transform_2(%arg0: i32) -> (i32, i32) {
    %c0_i32 = arith.constant 0 : i32
    %c0_i32_0 = arith.constant 0 : i32
    %c0_i32_1 = arith.constant 0 : i32
    return %c0_i32, %c0_i32_0 : i32, i32
  }
  func.func @transform_3(%arg0: i32) -> (i32, i32) {
    %c0_i32 = arith.constant 0 : i32
    %c0_i32_0 = arith.constant 0 : i32
    %c0_i32_1 = arith.constant 0 : i32
    return %c0_i32, %c0_i32_0 : i32, i32
  }
  func.func @transform_4(%arg0: i32) -> (i32, i32) {
    %c0_i32 = arith.constant 0 : i32
    %c0_i32_0 = arith.constant 0 : i32
    %c0_i32_1 = arith.constant 0 : i32
    return %c0_i32, %c0_i32_0 : i32, i32
  }
  func.func @transform_5(%arg0: i32) -> (i32, i32) {
    %c0_i32 = arith.constant 0 : i32
    %c0_i32_0 = arith.constant 0 : i32
    %c0_i32_1 = arith.constant 0 : i32
    return %c0_i32, %c0_i32_0 : i32, i32
  }
  func.func @transform_6(%arg0: i32) -> (i32, i32, i32) {
    %c0_i32 = arith.constant 0 : i32
    %c0_i32_0 = arith.constant 0 : i32
    %c0_i32_1 = arith.constant 0 : i32
    return %arg0, %c0_i32, %c0_i32_0 : i32, i32, i32
  }
}

</mosaic_0001>

<bundles_post_ra>
// kernel: tsn_recognizer_forward.1
= control target key start
LH: loop header
LB: loop body
LE: loop exit
PB: predicated region body
PF: predicated region fallthrough
CT: control target
= control target key end

     0   :  { %11 = vsyncpa [#allocation3], 0  ;;  %s6239_s0 = inlined_call_operand.vmem [shape: bf16[4096,36], index: 0, kind: input, shape index: {}]   ;;  %s6240_s1 = inlined_call_operand.vmem [shape: bf16[36,128], index: 1, kind: input, shape index: {}]   ;;  %s6241_s2 = inlined_call_operand.vmem [shape: f32[1,128], index: 2, kind: input, shape index: {}]   ;;  %s6242_s3 = inlined_call_operand.vmem [shape: f32[1,2048], index: 3, kind: input, shape index: {}]   ;;  %s6243_s4 = inlined_call_operand.vmem [shape: f32[128,128], index: 4, kind: input, shape index: {}]   ;;  %s6244_s5 = inlined_call_operand.vmem [shape: f32[1,128], index: 5, kind: input, shape index: {}]   ;;  %s6245_s6 = inlined_call_operand.hbm [shape: f32[2,1,128], index: 6, kind: output, shape index: {}]  }
   0x1   :  { %13 = vsyncpa [#allocation3 + $0x1], 0  ;;  %s5238_s21 = smov 0   ;;  %s5240_s22 = smov 0  }
   0x2   :  { %s5242_s23 = smov 0   ;;  %s5244_s24 = smov 0  }
   0x3 LB: > { %s5259_s25 = sadd.s32 4294967295, %s5197_s24   ;;  %s3677_s26 = sadd.s32 4294967294, %s5197_s24   ;;  %s5197_s24 = sphi %s5244_s24, %s6255_s24   ;;  %s5193_s23 = sphi %s5242_s23, %s6254_s23   ;;  %s5189_s22 = sphi %s5240_s22, %s6253_s22   ;;  %s5185_s21 = sphi %s5238_s21, %s6252_s21  }
   0x4   : > { %s5263_s27 = sadd.s32 1, %s5197_s24   ;;  %s157_s28 = sadd.s32 1, %s5193_s23 }
   0x5   : > { %s154_s29 = ssub.s32 %s5197_s24, %s5263_s27  ;;  %p167_p0 = scmp.ne.s32.totalorder %s5193_s23, %s5189_s22 }
   0x6   : > { %p155_p1 = scmp.eq.s32.totalorder %s154_s29, 0  ;;  %p168_p2 = scmp.eq.s32.totalorder %s5259_s25, 1 }
   0x7   : > { %p173_p3 = scmp.ne.s32.totalorder %s5189_s22, %s5185_s21  ;;  %p174_p4 = scmp.eq.s32.totalorder %s3677_s26, 1 }
   0x8   : > { %s5274_s30 = scalar_select %p155_p1, %s5193_s23, %s157_s28  }
   0x9   : > { %p5276_p5 = por %p168_p2, %p167_p0  ;;  %p5280_p6 = por %p174_p4, %p173_p3 }
   0xa   : > { %p3680_p7 = scmp.ge.s32.totalorder %s5197_s24, 1  ;;  %p216_p8 = scmp.lt.s32.totalorder %s5197_s24, 3 }
   0xc   : > { %p217_p9 = pnand %p3680_p7, %p216_p8 }
   0xd   : > { %v5001_v0 = vld [vmem:[%s6240_s1] sm:$0xff] (!%p217_p9)   ;;  %v5002_v1 = vld [vmem:[%s6240_s1 + $0x8] sm:$0xff] (!%p217_p9)   ;;  %s3681_s13 = sshll.u32 (!%p217_p9), %s5259_s25, 8  ;;  %v5003_v2 = vld [vmem:[%s6240_s1 + $0x10] ss:$0 sps:$4 sm:$0x33] (!%p217_p9)  }
   0xe   : > { %220 = sbr.rel (%p217_p9) target bundleno = 1140 (0x474), region = 44  ;;  %4374 = vmatprep.subr.bf16.mxu0 (!%p217_p9), %v5001_v0  ;;  %p246_p10 = scmp.lt.s32.totalorder (!%p217_p9), %s3681_s13, 511  ;;  %4951 = vmatprep.subr.bf16.mxu1 (!%p217_p9), %v5001_v0  ;;  %vm1560_vm0 = vcmask (!%p217_p9), 1041408   ;;  %vm1175_vm1 = vcmask (!%p217_p9), 293888   ;;  %vm5200_vm2 = vmmov (!%p217_p9), 0  }
   0xf   : > { %4375 = vmatpush3.bf16.msra.mxu0 (!%p217_p9), %v5001_v0  ;;  %4954 = vmatpush3.bf16.msra.mxu1 (!%p217_p9), %v5001_v0  ;;  %v1562_v3 = vsel (!%p217_p9), %vm1560_vm0, %v5003_v2, 0  ;;  %s3943_s28 = sshll.u32 (!%p217_p9), %s5259_s25, 4  ;;  %s5202_s25 = smov (!%p217_p9), [#allocation2]  }
  0x10   : > { %4376 = vmatprep.subr.bf16.mxu0 (!%p217_p9), %v5002_v1  ;;  %4952 = vmatprep.subr.bf16.mxu1 (!%p217_p9), %v5002_v1  ;;  %s6197_s12 = scalar_lea.hbm (!%p217_p9), %s6245_s6, %s3943_s28  ;;  %s5139_s15 = sshll.u32 (!%p217_p9), %s5202_s25, 4  ;;  %s5140_s15 = int_to_ptr.vmem [resolvable:$false] %s5139_s15 }
  0x13   : > { %4377 = vmatpush3.bf16.msra.mxu0 (!%p217_p9), %v5002_v1  ;;  %4955 = vmatpush3.bf16.msra.mxu1 (!%p217_p9), %v5002_v1 }
  0x14   : > { %4957 = vmatprep.subr.msk.bf16.mxu0 (!%p217_p9), %vm1560_vm0, %v5003_v2  ;;  %4958 = vmatprep.subr.msk.bf16.mxu1 (!%p217_p9), %vm1560_vm0, %v5003_v2 }
  0x15   : > { %s6257_s13 = smov (!%p246_p10, %s3681_s13), 511 }
  0x16   : > { %s3682_s16 = sshll.u32 %s6257_s13, 2 }
  0x17   : > { %s5299_s19 = scalar_lea.vmem %s6239_s0, %s3682_s16  ;;  %4379 = vmatpush3.bf16.msra.mxu0 %v1562_v3  ;;  %4956 = vmatpush3.bf16.msra.mxu1 %v1562_v3  ;;  %s5141_s16 = scalar_lea.vmem %s5140_s15, 32 }
  0x18   : > { %v5004_v4 = vld [vmem:[%s5299_s19] sm:$0xff]   ;;  %v5005_v5 = vld [vmem:[%s5299_s19 + $0x8] sm:$0xff]   ;;  %v5006_v6 = vld [vmem:[%s5299_s19 + $0x10] sm:$0xff]  }
  0x19   : > { %4380 = vmatprep.mubr.msk.bf16.mxu0 %vm1175_vm1, %v5004_v4  ;;  %v5007_v7 = vld [vmem:[%s5299_s19 + $0x18] sm:$0xff]   ;;  %v5008_v8 = vld [vmem:[%s5299_s19 + $0x20] sm:$0xff]   ;;  %v5009_v9 = vld [vmem:[%s5299_s19 + $0x28] sm:$0xff]  }
  0x1a   : > { %4381 = vmatmul.mubr.msk.bf16.vlgmr.msra.gmra.mrb[0].mxu0 %vm1175_vm1, %v5005_v5  ;;  %v5010_v10 = vld [vmem:[%s5299_s19 + $0x30] sm:$0xff]   ;;  %v5011_v11 = vld [vmem:[%s5299_s19 + $0x38] sm:$0xff]   ;;  %v5012_v12 = vld [vmem:[%s5299_s19 + $0x40] sm:$0xff]  }
  0x1b   : > { %4384 = vmatprep.mubr.msk.bf16.mxu0 %vm1175_vm1, %v5006_v6  ;;  %v5013_v13 = vld [vmem:[%s5299_s19 + $0x48] sm:$0xff]   ;;  %v5014_v14 = vld [vmem:[%s5299_s19 + $0x50] sm:$0xff]   ;;  %v5015_v15 = vld [vmem:[%s5299_s19 + $0x58] sm:$0xff]  }
  0x1c   : > { %v5016_v16 = vld [vmem:[%s5299_s19 + $0x60] sm:$0xff]   ;;  %v5017_v17 = vld [vmem:[%s5299_s19 + $0x68] sm:$0xff]   ;;  %v5018_v18 = vld [vmem:[%s5299_s19 + $0x70] sm:$0xff]  }
  0x1d   : > { %v5019_v19 = vld [vmem:[%s5299_s19 + $0x78] sm:$0xff]   ;;  %v5020_v20 = vld [vmem:[%s5299_s19 + $0x80] sm:$0xff]   ;;  %v5021_v21 = vld [vmem:[%s5299_s19 + $0x88] sm:$0xff]  }
  0x1e   : > { %v5022_v22 = vld [vmem:[%s5299_s19 + $0x90] sm:$0xff]   ;;  %v5055_v24 = vld [vmem:[%s5299_s19 + $0x318] sm:$0xff]   ;;  %v5024_v26 = vld [vmem:[%s5299_s19 + $0xa0] sm:$0xff]  }
  0x1f   : > { %v5054_v23 = vld [vmem:[%s5299_s19 + $0x310] sm:$0xff]   ;;  %v5023_v25 = vld [vmem:[%s5299_s19 + $0x98] sm:$0xff]   ;;  %v5058_v27 = vld [vmem:[%s5299_s19 + $0x320] sm:$0xff]  }
  0x20   : > { %4576 = vmatprep.mubr.msk.bf16.mxu1 %vm1175_vm1, %v5054_v23  ;;  %v5059_v28 = vld [vmem:[%s5299_s19 + $0x328] sm:$0xff]   ;;  %v5026_v30 = vld [vmem:[%s5299_s19 + $0xb0] sm:$0xff]   ;;  %v5027_v31 = vld [vmem:[%s5299_s19 + $0xb8] sm:$0xff]  }
  0x21   : > { %4577 = vmatmul.mubr.msk.bf16.vlgmr.msra.gmra.mrb[0].mxu1 %vm1175_vm1, %v5055_v24  ;;  %v5025_v29 = vld [vmem:[%s5299_s19 + $0xa8] sm:$0xff]   ;;  %v5062_v32 = vld [vmem:[%s5299_s19 + $0x330] sm:$0xff]   ;;  %v5063_v33 = vld [vmem:[%s5299_s19 + $0x338] sm:$0xff]  }
  0x22   : > { %4385 = vmatmul.mubr.msk.bf16.gmra.mrb[4].mxu0 %vm1175_vm1, %v5007_v7  ;;  %4580 = vmatprep.mubr.msk.bf16.mxu1 %vm1175_vm1, %v5058_v27  ;;  %v5028_v34 = vld [vmem:[%s5299_s19 + $0xc0] sm:$0xff]   ;;  %v5029_v35 = vld [vmem:[%s5299_s19 + $0xc8] sm:$0xff]   ;;  %v5030_v38 = vld [vmem:[%s5299_s19 + $0xd0] sm:$0xff]  }
  0x23   : > { %4388 = vmatprep.mubr.msk.bf16.mxu0 %vm1175_vm1, %v5008_v8  ;;  %v5066_v36 = vld [vmem:[%s5299_s19 + $0x340] sm:$0xff]   ;;  %v5067_v37 = vld [vmem:[%s5299_s19 + $0x348] sm:$0xff]   ;;  %v5031_v39 = vld [vmem:[%s5299_s19 + $0xd8] sm:$0xff]  }
  0x24   : > { %v5070_v40 = vld [vmem:[%s5299_s19 + $0x350] sm:$0xff]   ;;  %v5071_v41 = vld [vmem:[%s5299_s19 + $0x358] sm:$0xff]   ;;  %v5032_v42 = vld [vmem:[%s5299_s19 + $0xe0] sm:$0xff]  }
  0x25   : > { %v5074_v43 = vld [vmem:[%s5299_s19 + $0x360] sm:$0xff]   ;;  %v5033_v44 = vld [vmem:[%s5299_s19 + $0xe8] sm:$0xff]   ;;  %v5034_v46 = vld [vmem:[%s5299_s19 + $0xf0] sm:$0xff]  }
  0x26   : > { %v5075_v45 = vld [vmem:[%s5299_s19 + $0x368] sm:$0xff]   ;;  %v5078_v47 = vld [vmem:[%s5299_s19 + $0x370] sm:$0xff]   ;;  %v5035_v48 = vld [vmem:[%s5299_s19 + $0xf8] sm:$0xff]  }
  0x27   : > { %v5079_v49 = vld [vmem:[%s5299_s19 + $0x378] sm:$0xff]   ;;  %v5036_v50 = vld [vmem:[%s5299_s19 + $0x100] sm:$0xff]   ;;  %v5037_v52 = vld [vmem:[%s5299_s19 + $0x108] sm:$0xff]  }
  0x28   : > { %v5082_v51 = vld [vmem:[%s5299_s19 + $0x380] sm:$0xff]   ;;  %v5083_v53 = vld [vmem:[%s5299_s19 + $0x388] sm:$0xff]   ;;  %v5038_v54 = vld [vmem:[%s5299_s19 + $0x110] sm:$0xff]  }
  0x29   : > { %4581 = vmatmul.mubr.msk.bf16.gmra.mrb[4].mxu1 %vm1175_vm1, %v5059_v28  ;;  %v5086_v55 = vld [vmem:[%s5299_s19 + $0x390] sm:$0xff]   ;;  %v5039_v56 = vld [vmem:[%s5299_s19 + $0x118] sm:$0xff]   ;;  %v5040_v58 = vld [vmem:[%s5299_s19 + $0x120] sm:$0xff]  }
  0x2a   : > { %4389 = vmatmul.mubr.msk.bf16.gmra.mrb[8].mxu0 %vm1175_vm1, %v5009_v9  ;;  %4584 = vmatprep.mubr.msk.bf16.mxu1 %vm1175_vm1, %v5062_v32  ;;  %v5087_v57 = vld [vmem:[%s5299_s19 + $0x398] sm:$0xff]   ;;  %v5090_v59 = vld [vmem:[%s5299_s19 + $0x3a0] sm:$0xff]   ;;  %v5041_v60 = vld [vmem:[%s5299_s19 + $0x128] sm:$0xff]  }
  0x2b   : > { %4392 = vmatprep.mubr.msk.bf16.mxu0 %vm1175_vm1, %v5010_v10  ;;  %v5091_v61 = vld [vmem:[%s5299_s19 + $0x3a8] sm:$0xff]   ;;  %v5042_v62 = vld [vmem:[%s5299_s19 + $0x130] sm:$0xff]   ;;  %v5043_v0 = vld [vmem:[%s5299_s19 + $0x138] sm:$0xff]  }
  0x2c   : > { %v5094_v63 = vld [vmem:[%s5299_s19 + $0x3b0] sm:$0xff]   ;;  %v5095_v1 = vld [vmem:[%s5299_s19 + $0x3b8] sm:$0xff]   ;;  %v5044_v2 = vld [vmem:[%s5299_s19 + $0x140] sm:$0xff]  }
  0x2d   : > { %v5098_v3 = vld [vmem:[%s5299_s19 + $0x3c0] sm:$0xff]   ;;  %v5045_v4 = vld [vmem:[%s5299_s19 + $0x148] sm:$0xff]   ;;  %v5046_v6 = vld [vmem:[%s5299_s19 + $0x150] sm:$0xff]  }
  0x2e   : > { %v5099_v5 = vld [vmem:[%s5299_s19 + $0x3c8] sm:$0xff]   ;;  %v5102_v7 = vld [vmem:[%s5299_s19 + $0x3d0] sm:$0xff]   ;;  %v5047_v8 = vld [vmem:[%s5299_s19 + $0x158] sm:$0xff]  }
  0x2f   : > { %v5103_v9 = vld [vmem:[%s5299_s19 + $0x3d8] sm:$0xff]   ;;  %v5048_v10 = vld [vmem:[%s5299_s19 + $0x160] sm:$0xff]   ;;  %v5053_v24 = vld [vmem:[%s5299_s19 + $0x188] sm:$0xff]  }
  0x30   : > { %v5060_v27 = vld [vmem:[%s5299_s19 + $0x1a0] sm:$0xff]   ;;  %v5061_v28 = vld [vmem:[%s5299_s19 + $0x1a8] sm:$0xff]  }
  0x31   : > { %4585 = vmatmul.mubr.msk.bf16.gmra.mrb[8].mxu1 %vm1175_vm1, %v5063_v33 }
  0x32   : > { %4393 = vmatmul.mubr.msk.bf16.gmra.mrb[12].mxu0 %vm1175_vm1, %v5011_v11  ;;  %4588 = vmatprep.mubr.msk.bf16.mxu1 %vm1175_vm1, %v5066_v36  ;;  %v5106_v11 = vld [vmem:[%s5299_s19 + $0x3e0] sm:$0xff]  }
  0x33   : > { %4396 = vmatprep.mubr.msk.bf16.mxu0 %vm1175_vm1, %v5012_v12  ;;  %v5049_v12 = vld [vmem:[%s5299_s19 + $0x168] sm:$0xff]  }
  0x39   : > { %4589 = vmatmul.mubr.msk.bf16.gmra.mrb[12].mxu1 %vm1175_vm1, %v5067_v37  ;;  %v5068_v37 = vld [vmem:[%s5299_s19 + $0x1c0] sm:$0xff]  }
  0x3a   : > { %4397 = vmatmul.mubr.msk.bf16.gmra.mrb[16].mxu0 %vm1175_vm1, %v5013_v13  ;;  %4592 = vmatprep.mubr.msk.bf16.mxu1 %vm1175_vm1, %v5070_v40  ;;  %v5107_v13 = vld [vmem:[%s5299_s19 + $0x3e8] sm:$0xff]  }
  0x3b   : > { %4400 = vmatprep.mubr.msk.bf16.mxu0 %vm1175_vm1, %v5014_v14  ;;  %v5050_v14 = vld [vmem:[%s5299_s19 + $0x170] sm:$0xff]  }
  0x41   : > { %4593 = vmatmul.mubr.msk.bf16.gmra.mrb[16].mxu1 %vm1175_vm1, %v5071_v41 }
  0x42   : > { %4401 = vmatmul.mubr.msk.bf16.gmra.mrb[20].mxu0 %vm1175_vm1, %v5015_v15  ;;  %4596 = vmatprep.mubr.msk.bf16.mxu1 %vm1175_vm1, %v5074_v43  ;;  %v5110_v15 = vld [vmem:[%s5299_s19 + $0x3f0] sm:$0xff]  }
  0x43   : > { %4404 = vmatprep.mubr.msk.bf16.mxu0 %vm1175_vm1, %v5016_v16  ;;  %v5051_v16 = vld [vmem:[%s5299_s19 + $0x178] sm:$0xff]  }
  0x49   : > { %4597 = vmatmul.mubr.msk.bf16.gmra.mrb[20].mxu1 %vm1175_vm1, %v5075_v45 }
  0x4a   : > { %4405 = vmatmul.mubr.msk.bf16.gmra.mrb[24].mxu0 %vm1175_vm1, %v5017_v17  ;;  %4600 = vmatprep.mubr.msk.bf16.mxu1 %vm1175_vm1, %v5078_v47  ;;  %v5111_v17 = vld [vmem:[%s5299_s19 + $0x3f8] sm:$0xff]  }
  0x4b   : > { %4408 = vmatprep.mubr.msk.bf16.mxu0 %vm1175_vm1, %v5018_v18  ;;  %v5052_v18 = vld [vmem:[%s5299_s19 + $0x180] sm:$0xff]  }
  0x51   : > { %4601 = vmatmul.mubr.msk.bf16.gmra.mrb[24].mxu1 %vm1175_vm1, %v5079_v49 }
  0x52   : > { %4409 = vmatmul.mubr.msk.bf16.gmra.mrb[28].mxu0 %vm1175_vm1, %v5019_v19  ;;  %4604 = vmatprep.mubr.msk.bf16.mxu1 %vm1175_vm1, %v5082_v51  ;;  %v2881_v19 = vlaneseq }
  0x53   : > { %4412 = vmatprep.mubr.msk.bf16.mxu0 %vm1175_vm1, %v5020_v20 }
  0x54   : > { %v5457_v20 = vshrl.u32 %v2881_v19, 7 }
  0x59   : > { %4605 = vmatmul.mubr.msk.bf16.gmra.mrb[28].mxu1 %vm1175_vm1, %v5083_v53  ;;  %v5072_v53 = vld [vmem:[%s5299_s19 + $0x1d0] sm:$0xff]  }
  0x5a   : > { %4413 = vmatmul.mubr.msk.bf16.gmra.mrb[32].mxu0 %vm1175_vm1, %v5021_v21  ;;  %4608 = vmatprep.mubr.msk.bf16.mxu1 %vm1175_vm1, %v5086_v55  ;;  %v2887_v21 = vsub.s32 1, %v5457_v20 }
  0x5b   : > { %4416 = vmatprep.mubr.msk.bf16.mxu0 %vm1175_vm1, %v5022_v22  ;;  %v5465_v22 = vld [vmem:[%s6242_s3] sm:$0xff] }
  0x5c   : > { %v2888_v23 = vrot.slane %v5465_v22, %v2887_v21 }
  0x61   : > { %4609 = vmatmul.mubr.msk.bf16.gmra.mrb[32].mxu1 %vm1175_vm1, %v5087_v57 }
  0x62   : > { %4417 = vmatmul.mubr.msk.bf16.gmra.mrb[36].mxu0 %vm1175_vm1, %v5023_v25  ;;  %4612 = vmatprep.mubr.msk.bf16.mxu1 %vm1175_vm1, %v5090_v59  ;;  %v5056_v25 = vld [vmem:[%s5299_s19 + $0x190] sm:$0xff]  }
  0x63   : > { %4420 = vmatprep.mubr.msk.bf16.mxu0 %vm1175_vm1, %v5024_v26  ;;  %v5057_v26 = vld [vmem:[%s5299_s19 + $0x198] sm:$0xff]  }
  0x69   : > { %4613 = vmatmul.mubr.msk.bf16.gmra.mrb[36].mxu1 %vm1175_vm1, %v5091_v61 }
  0x6a   : > { %4421 = vmatmul.mubr.msk.bf16.gmra.mrb[40].mxu0 %vm1175_vm1, %v5025_v29  ;;  %4616 = vmatprep.mubr.msk.bf16.mxu1 %vm1175_vm1, %v5094_v63  ;;  %v5064_v29 = vld [vmem:[%s5299_s19 + $0x1b0] sm:$0xff]  }
  0x6b   : > { %4424 = vmatprep.mubr.msk.bf16.mxu0 %vm1175_vm1, %v5026_v30  ;;  %v5484_v30 = vld [vmem:[%s6241_s2] ss:$0 sm:$0xff] }
  0x71   : > { %4617 = vmatmul.mubr.msk.bf16.gmra.mrb[40].mxu1 %vm1175_vm1, %v5095_v1 }
  0x72   : > { %4425 = vmatmul.mubr.msk.bf16.gmra.mrb[44].mxu0 %vm1175_vm1, %v5027_v31  ;;  %4620 = vmatprep.mubr.msk.bf16.mxu1 %vm1175_vm1, %v5098_v3 }
  0x73   : > { %4428 = vmatprep.mubr.msk.bf16.mxu0 %vm1175_vm1, %v5028_v34  ;;  %v5065_v34 = vld [vmem:[%s5299_s19 + $0x1b8] sm:$0xff]  }
  0x79   : > { %4621 = vmatmul.mubr.msk.bf16.gmra.mrb[44].mxu1 %vm1175_vm1, %v5099_v5  ;;  %v5076_v5 = vld [vmem:[%s5299_s19 + $0x1e0] sm:$0xff]  }
  0x7a   : > { %4429 = vmatmul.mubr.msk.bf16.gmra.mrb[48].mxu0 %vm1175_vm1, %v5029_v35  ;;  %4624 = vmatprep.mubr.msk.bf16.mxu1 %vm1175_vm1, %v5102_v7 }
  0x7b   : > { %4432 = vmatprep.mubr.msk.bf16.mxu0 %vm1175_vm1, %v5030_v38 }
  0x81   : > { %4625 = vmatmul.mubr.msk.bf16.gmra.mrb[48].mxu1 %vm1175_vm1, %v5103_v9 }
  0x82   : > { %4433 = vmatmul.mubr.msk.bf16.gmra.mrb[52].mxu0 %vm1175_vm1, %v5031_v39  ;;  %4628 = vmatprep.mubr.msk.bf16.mxu1 %vm1175_vm1, %v5106_v11 }
  0x83   : > { %4436 = vmatprep.mubr.msk.bf16.mxu0 %vm1175_vm1, %v5032_v42 }
  0x89   : > { %4629 = vmatmul.mubr.msk.bf16.gmra.mrb[52].mxu1 %vm1175_vm1, %v5107_v13 }
  0x8a   : > { %4437 = vmatmul.mubr.msk.bf16.gmra.mrb[56].mxu0 %vm1175_vm1, %v5033_v44  ;;  %4632 = vmatprep.mubr.msk.bf16.mxu1 %vm1175_vm1, %v5110_v15 }
  0x8b   : > { %4440 = vmatprep.mubr.msk.bf16.mxu0 %vm1175_vm1, %v5034_v46 }
  0x91   : > { %4633 = vmatmul.mubr.msk.bf16.gmra.mrb[56].mxu1 %vm1175_vm1, %v5111_v17 }
  0x92   : > { %4441 = vmatmul.mubr.msk.bf16.gmra.mrb[60].mxu0 %vm1175_vm1, %v5035_v48  ;;  %3025 = vmatprep.mubr.f32.mxu1 %v2888_v23 }
  0x93   : > { %4444 = vmatprep.mubr.msk.bf16.mxu0 %vm1175_vm1, %v5036_v50  ;;  %v5069_v50 = vld [vmem:[%s5299_s19 + $0x1c8] sm:$0xff]  }
  0x9a   : > { %4445 = vmatmul.mubr.msk.bf16.gmra.mrb[64].mxu0 %vm1175_vm1, %v5037_v52 }
  0x9b   : > { %4448 = vmatprep.mubr.msk.bf16.mxu0 %vm1175_vm1, %v5038_v54 }
  0xa2   : > { %4449 = vmatmul.mubr.msk.bf16.gmra.mrb[68].mxu0 %vm1175_vm1, %v5039_v56 }
  0xa3   : > { %4452 = vmatprep.mubr.msk.bf16.mxu0 %vm1175_vm1, %v5040_v58 }
  0xaa   : > { %4453 = vmatmul.mubr.msk.bf16.gmra.mrb[72].mxu0 %vm1175_vm1, %v5041_v60 }
  0xab   : > { %4456 = vmatprep.mubr.msk.bf16.mxu0 %vm1175_vm1, %v5042_v62 }
  0xb2   : > { %4457 = vmatmul.mubr.msk.bf16.gmra.mrb[76].mxu0 %vm1175_vm1, %v5043_v0 }
  0xb3   : > { %4460 = vmatprep.mubr.msk.bf16.mxu0 %vm1175_vm1, %v5044_v2  ;;  %v5073_v2 = vld [vmem:[%s5299_s19 + $0x1d8] sm:$0xff]  }
  0xba   : > { %4461 = vmatmul.mubr.msk.bf16.gmra.mrb[80].mxu0 %vm1175_vm1, %v5045_v4 }
  0xbb   : > { %4464 = vmatprep.mubr.msk.bf16.mxu0 %vm1175_vm1, %v5046_v6 }
  0xc2   : > { %4465 = vmatmul.mubr.msk.bf16.gmra.mrb[84].mxu0 %vm1175_vm1, %v5047_v8 }
  0xc3   : > { %4468 = vmatprep.mubr.msk.bf16.mxu0 %vm1175_vm1, %v5048_v10 }
  0xca   : > { %4469 = vmatmul.mubr.msk.bf16.gmra.mrb[88].mxu0 %vm1175_vm1, %v5049_v12 }
  0xcb   : > { %4472 = vmatprep.mubr.msk.bf16.mxu0 %vm1175_vm1, %v5050_v14 }
  0xd2   : > { %4473 = vmatmul.mubr.msk.bf16.gmra.mrb[92].mxu0 %vm1175_vm1, %v5051_v16 }
  0xd3   : > { %4476 = vmatprep.mubr.msk.bf16.mxu0 %vm1175_vm1, %v5052_v18  ;;  %v5077_v18 = vld [vmem:[%s5299_s19 + $0x1e8] sm:$0xff]  }
  0xda   : > { %4477 = vmatmul.mubr.msk.bf16.gmra.mrb[96].mxu0 %vm1175_vm1, %v5053_v24  ;;  %v5080_v24 = vld [vmem:[%s5299_s19 + $0x1f0] sm:$0xff]  }
  0xdb   : > { %4480 = vmatprep.mubr.msk.bf16.mxu0 %vm1175_vm1, %v5056_v25 }
  0xe2   : > { %4481 = vmatmul.mubr.msk.bf16.gmra.mrb[100].mxu0 %vm1175_vm1, %v5057_v26 }
  0xe3   : > { %4484 = vmatprep.mubr.msk.bf16.mxu0 %vm1175_vm1, %v5060_v27 }
  0xea   : > { %4485 = vmatmul.mubr.msk.bf16.gmra.mrb[104].mxu0 %vm1175_vm1, %v5061_v28 }
  0xeb   : > { %4488 = vmatprep.mubr.msk.bf16.mxu0 %vm1175_vm1, %v5064_v29 }
  0xed   : > { %v4382_v31 = vpop.f32.mrb[0].mxu0 }
  0xee   : > { %v1607_v32 = vadd.f32 %v4382_v31, %v5484_v30  ;;  %v1598_v33 = vpop.f32.mrb[1].mxu0 }
  0xef   : > { %v1599_v35 = vadd.f32 %v5484_v30, %v1598_v33  ;;  %v4383_v36 = vpop.f32.mrb[2].mxu0 }
  0xf0   : > { %v1610_v38 = vadd.f32 %v4383_v36, %v5484_v30  ;;  %v1601_v39 = vpop.f32.mrb[3].mxu0  ;;  %v2623_v41 = vmax.f32 %v1607_v32, 0.0 }
  0xf1   : > { %v1602_v40 = vadd.f32 %v5484_v30, %v1601_v39  ;;  %v2621_v43 = vmax.f32 %v1599_v35, 0.0 }
  0xf2   : > { %v2624_v42 = vmax.f32 %v1610_v38, 0.0  ;;  %4489 = vmatmul.mubr.msk.bf16.gmra.mrb[108].mxu0 %vm1175_vm1, %v5065_v34  ;;  %v5081_v38 = vld [vmem:[%s5299_s19 + $0x1f8] sm:$0xff]  }
  0xf3   : > { %v2622_v44 = vmax.f32 %v1602_v40, 0.0  ;;  %4492 = vmatprep.mubr.msk.bf16.mxu0 %vm1175_vm1, %v5068_v37 }
  0xf4   : > { %v5495_v45 = vpack.c.bf16 %v2624_v42, %v2623_v41  ;;  %v5084_v41 = vld [vmem:[%s5299_s19 + $0x200] sm:$0xff]  }
  0xf5   : > { %v5497_v46 = vpack.c.bf16 %v2622_v44, %v2621_v43  ;;  %v4386_v47 = vpop.f32.mrb[4].mxu0 }
  0xf6   : > { %v1623_v48 = vadd.f32 %v4386_v47, %v5484_v30  ;;  %v1614_v49 = vpop.f32.mrb[5].mxu0 }
  0xf7   : > { %v1615_v51 = vadd.f32 %v5484_v30, %v1614_v49  ;;  %v4387_v52 = vpop.f32.mrb[6].mxu0 }
  0xf8   : > { %v1626_v54 = vadd.f32 %v4387_v52, %v5484_v30  ;;  %v1617_v55 = vpop.f32.mrb[7].mxu0  ;;  %v2627_v57 = vmax.f32 %v1623_v48, 0.0 }
  0xf9   : > { %v1618_v56 = vadd.f32 %v5484_v30, %v1617_v55  ;;  %v2625_v59 = vmax.f32 %v1615_v51, 0.0 }
  0xfa   : > { %v2628_v58 = vmax.f32 %v1626_v54, 0.0  ;;  %4493 = vmatmul.mubr.msk.bf16.gmra.mrb[112].mxu0 %vm1175_vm1, %v5069_v50 }
  0xfb   : > { %v2626_v60 = vmax.f32 %v1618_v56, 0.0  ;;  %4496 = vmatprep.mubr.msk.bf16.mxu0 %vm1175_vm1, %v5072_v53  ;;  %v5085_v56 = vld [vmem:[%s5299_s19 + $0x208] sm:$0xff]  }
  0xfc   : > { %v5507_v61 = vpack.c.bf16 %v2628_v58, %v2627_v57 }
  0xfd   : > { %v5509_v62 = vpack.c.bf16 %v2626_v60, %v2625_v59  ;;  %v4390_v63 = vpop.f32.mrb[8].mxu0  ;;  %v5088_v59 = vld [vmem:[%s5299_s19 + $0x210] sm:$0xff]  }
  0xfe   : > { %v1639_v0 = vadd.f32 %v4390_v63, %v5484_v30  ;;  %v1630_v1 = vpop.f32.mrb[9].mxu0 }
  0xff   : > { %v1631_v3 = vadd.f32 %v5484_v30, %v1630_v1  ;;  %v4391_v4 = vpop.f32.mrb[10].mxu0 }
 0x100   : > { %v1642_v6 = vadd.f32 %v4391_v4, %v5484_v30  ;;  %v1633_v7 = vpop.f32.mrb[11].mxu0  ;;  %v2631_v9 = vmax.f32 %v1639_v0, 0.0 }
 0x101   : > { %v1634_v8 = vadd.f32 %v5484_v30, %v1633_v7  ;;  %v2629_v11 = vmax.f32 %v1631_v3, 0.0 }
 0x102   : > { %v2632_v10 = vmax.f32 %v1642_v6, 0.0  ;;  %4497 = vmatmul.mubr.msk.bf16.gmra.mrb[116].mxu0 %vm1175_vm1, %v5073_v2 }
 0x103   : > { %v2630_v12 = vmax.f32 %v1634_v8, 0.0  ;;  %4500 = vmatprep.mubr.msk.bf16.mxu0 %vm1175_vm1, %v5076_v5 }
 0x104   : > { %v5519_v13 = vpack.c.bf16 %v2632_v10, %v2631_v9  ;;  %v5089_v9 = vld [vmem:[%s5299_s19 + $0x218] sm:$0xff]  }
 0x105   : > { %v5521_v14 = vpack.c.bf16 %v2630_v12, %v2629_v11  ;;  %v4394_v15 = vpop.f32.mrb[12].mxu0  ;;  %v5092_v12 = vld [vmem:[%s5299_s19 + $0x220] sm:$0xff]  }
 0x106   : > { %v1655_v16 = vadd.f32 %v4394_v15, %v5484_v30  ;;  %v1646_v17 = vpop.f32.mrb[13].mxu0 }
 0x107   : > { %v1647_v19 = vadd.f32 %v5484_v30, %v1646_v17  ;;  %v4395_v23 = vpop.f32.mrb[14].mxu0 }
 0x108   : > { %v1658_v25 = vadd.f32 %v4395_v23, %v5484_v30  ;;  %v1649_v26 = vpop.f32.mrb[15].mxu0  ;;  %v2635_v28 = vmax.f32 %v1655_v16, 0.0 }
 0x109   : > { %v1650_v27 = vadd.f32 %v5484_v30, %v1649_v26  ;;  %v2633_v31 = vmax.f32 %v1647_v19, 0.0 }
 0x10a   : > { %v2636_v29 = vmax.f32 %v1658_v25, 0.0  ;;  %4501 = vmatmul.mubr.msk.bf16.gmra.mrb[120].mxu0 %vm1175_vm1, %v5077_v18 }
 0x10b   : > { %v2634_v32 = vmax.f32 %v1650_v27, 0.0  ;;  %4504 = vmatprep.mubr.msk.bf16.mxu0 %vm1175_vm1, %v5080_v24 }
 0x10c   : > { %v5531_v33 = vpack.c.bf16 %v2636_v29, %v2635_v28  ;;  %v5093_v28 = vld [vmem:[%s5299_s19 + $0x228] sm:$0xff]  }
 0x10d   : > { %v5533_v34 = vpack.c.bf16 %v2634_v32, %v2633_v31  ;;  %v4398_v35 = vpop.f32.mrb[16].mxu0  ;;  %v5096_v32 = vld [vmem:[%s5299_s19 + $0x230] sm:$0xff]  }
 0x10e   : > { %v1671_v36 = vadd.f32 %v4398_v35, %v5484_v30  ;;  %v1662_v37 = vpop.f32.mrb[17].mxu0 }
 0x10f   : > { %v1663_v39 = vadd.f32 %v5484_v30, %v1662_v37  ;;  %v4399_v40 = vpop.f32.mrb[18].mxu0 }
 0x110   : > { %v1674_v42 = vadd.f32 %v4399_v40, %v5484_v30  ;;  %v1665_v43 = vpop.f32.mrb[19].mxu0  ;;  %v2639_v47 = vmax.f32 %v1671_v36, 0.0 }
 0x111   : > { %v1666_v44 = vadd.f32 %v5484_v30, %v1665_v43  ;;  %v2637_v49 = vmax.f32 %v1663_v39, 0.0 }
 0x112   : > { %v2640_v48 = vmax.f32 %v1674_v42, 0.0  ;;  %4505 = vmatmul.mubr.msk.bf16.gmra.mrb[124].mxu0 %vm1175_vm1, %v5081_v38 }
 0x113   : > { %v2638_v50 = vmax.f32 %v1666_v44, 0.0  ;;  %4508 = vmatprep.mubr.msk.bf16.mxu0 %vm1175_vm1, %v5084_v41 }
 0x114   : > { %v4675_v51 = vpack.c.bf16 %v2640_v48, %v2639_v47  ;;  %v5097_v47 = vld [vmem:[%s5299_s19 + $0x238] sm:$0xff]  }
 0x115   : > { %v4671_v52 = vpack.c.bf16 %v2638_v50, %v2637_v49  ;;  %v4402_v53 = vpop.f32.mrb[20].mxu0  ;;  %v5100_v50 = vld [vmem:[%s5299_s19 + $0x240] sm:$0xff]  }
 0x116   : > { %v1687_v54 = vadd.f32 %v4402_v53, %v5484_v30  ;;  %v1678_v55 = vpop.f32.mrb[21].mxu0 }
 0x117   : > { %v1679_v57 = vadd.f32 %v5484_v30, %v1678_v55  ;;  %v4403_v58 = vpop.f32.mrb[22].mxu0  ;;  %4672 = vmatprep.subr.bf16.mxu1 %v4671_v52 }
 0x118   : > { %v1690_v60 = vadd.f32 %v4403_v58, %v5484_v30  ;;  %v1681_v63 = vpop.f32.mrb[23].mxu0  ;;  %4674 = vmatpush3.bf16.msra.mxu1 %v5497_v46  ;;  %v2643_v1 = vmax.f32 %v1687_v54, 0.0 }
 0x119   : > { %v1682_v0 = vadd.f32 %v5484_v30, %v1681_v63  ;;  %4676 = vmatprep.subr.bf16.mxu1 %v4675_v51  ;;  %v2641_v3 = vmax.f32 %v1679_v57, 0.0  ;;  %v2883_v51 = vsub.s32 0, %v5457_v20 }
 0x11a   : > { %v2644_v2 = vmax.f32 %v1690_v60, 0.0  ;;  %4509 = vmatmul.mubr.msk.bf16.gmra.mrb[128].mxu0 %vm1175_vm1, %v5085_v56 }
 0x11b   : > { %v2642_v4 = vmax.f32 %v1682_v0, 0.0  ;;  %4512 = vmatprep.mubr.msk.bf16.mxu0 %vm1175_vm1, %v5088_v59  ;;  %v2884_v59 = vrot.slane %v5465_v22, %v2883_v51 }
 0x11c   : > { %v4683_v5 = vpack.c.bf16 %v2644_v2, %v2643_v1  ;;  %4678 = vmatpush3.bf16.msra.mxu1 %v5495_v45 }
 0x11d   : > { %v4679_v6 = vpack.c.bf16 %v2642_v4, %v2641_v3  ;;  %v4406_v7 = vpop.f32.mrb[24].mxu0  ;;  %v5101_v3 = vld [vmem:[%s5299_s19 + $0x248] sm:$0xff]  }
 0x11e   : > { %v1703_v8 = vadd.f32 %v4406_v7, %v5484_v30  ;;  %v1694_v46 = vpop.f32.mrb[25].mxu0 }
 0x11f   : > { %v1695_v10 = vadd.f32 %v5484_v30, %v1694_v46  ;;  %v4407_v11 = vpop.f32.mrb[26].mxu0  ;;  %4680 = vmatprep.subr.bf16.mxu1 %v4679_v6  ;;  %v5104_v6 = vld [vmem:[%s5299_s19 + $0x250] sm:$0xff]  }
 0x120   : > { %v1706_v15 = vadd.f32 %v4407_v11, %v5484_v30  ;;  %v1697_v16 = vpop.f32.mrb[27].mxu0  ;;  %4682 = vmatpush3.bf16.msra.mxu1 %v5509_v62  ;;  %v2647_v45 = vmax.f32 %v1703_v8, 0.0 }
 0x121   : > { %v1698_v17 = vadd.f32 %v5484_v30, %v1697_v16  ;;  %4684 = vmatprep.subr.bf16.mxu1 %v4683_v5  ;;  %v2645_v19 = vmax.f32 %v1695_v10, 0.0 }
 0x122   : > { %v2648_v18 = vmax.f32 %v1706_v15, 0.0  ;;  %4513 = vmatmul.mubr.msk.bf16.gmra.mrb[132].mxu0 %vm1175_vm1, %v5089_v9 }
 0x123   : > { %v2646_v23 = vmax.f32 %v1698_v17, 0.0  ;;  %4516 = vmatprep.mubr.msk.bf16.mxu0 %vm1175_vm1, %v5092_v12 }
 0x124   : > { %v4691_v24 = vpack.c.bf16 %v2648_v18, %v2647_v45  ;;  %4686 = vmatpush3.bf16.msra.mxu1 %v5507_v61  ;;  %v5105_v18 = vld [vmem:[%s5299_s19 + $0x258] sm:$0xff]  }
 0x125   : > { %v4687_v25 = vpack.c.bf16 %v2646_v23, %v2645_v19  ;;  %v4410_v26 = vpop.f32.mrb[28].mxu0 }
 0x126   : > { %v1719_v27 = vadd.f32 %v4410_v26, %v5484_v30  ;;  %v1710_v62 = vpop.f32.mrb[29].mxu0 }
 0x127   : > { %v1711_v29 = vadd.f32 %v5484_v30, %v1710_v62  ;;  %v4411_v31 = vpop.f32.mrb[30].mxu0  ;;  %4688 = vmatprep.subr.bf16.mxu1 %v4687_v25 }
 0x128   : > { %v1722_v35 = vadd.f32 %v4411_v31, %v5484_v30  ;;  %v1713_v36 = vpop.f32.mrb[31].mxu0  ;;  %4690 = vmatpush3.bf16.msra.mxu1 %v5521_v14  ;;  %v2651_v61 = vmax.f32 %v1719_v27, 0.0 }
 0x129   : > { %v1714_v37 = vadd.f32 %v5484_v30, %v1713_v36  ;;  %4692 = vmatprep.subr.bf16.mxu1 %v4691_v24  ;;  %v2649_v39 = vmax.f32 %v1711_v29, 0.0  ;;  %v5108_v24 = vld [vmem:[%s5299_s19 + $0x260] sm:$0xff]  }
 0x12a   : > { %v2652_v38 = vmax.f32 %v1722_v35, 0.0  ;;  %4517 = vmatmul.mubr.msk.bf16.gmra.mrb[136].mxu0 %vm1175_vm1, %v5093_v28 }
 0x12b   : > { %v2650_v40 = vmax.f32 %v1714_v37, 0.0  ;;  %4520 = vmatprep.mubr.msk.bf16.mxu0 %vm1175_vm1, %v5096_v32 }
 0x12c   : > { %v4699_v41 = vpack.c.bf16 %v2652_v38, %v2651_v61  ;;  %4694 = vmatpush3.bf16.msra.mxu1 %v5519_v13  ;;  %v2895_v13 = vsub.s32 3, %v5457_v20  ;;  %v5109_v38 = vld [vmem:[%s5299_s19 + $0x268] sm:$0xff]  }
 0x12d   : > { %v4695_v42 = vpack.c.bf16 %v2650_v40, %v2649_v39  ;;  %v4414_v43 = vpop.f32.mrb[32].mxu0 }
 0x12e   : > { %v1735_v44 = vadd.f32 %v4414_v43, %v5484_v30  ;;  %v1726_v14 = vpop.f32.mrb[33].mxu0  ;;  %v2896_v60 = vrot.slane %v5465_v22, %v2895_v13 }
 0x12f   : > { %v1727_v48 = vadd.f32 %v5484_v30, %v1726_v14  ;;  %v4415_v49 = vpop.f32.mrb[34].mxu0  ;;  %4696 = vmatprep.subr.bf16.mxu1 %v4695_v42 }
 0x130   : > { %v1738_v52 = vadd.f32 %v4415_v49, %v5484_v30  ;;  %v1729_v53 = vpop.f32.mrb[35].mxu0  ;;  %4698 = vmatpush3.bf16.msra.mxu1 %v5533_v34  ;;  %v2655_v55 = vmax.f32 %v1735_v44, 0.0 }
 0x131   : > { %v1730_v54 = vadd.f32 %v5484_v30, %v1729_v53  ;;  %4700 = vmatprep.subr.bf16.mxu1 %v4699_v41  ;;  %v2653_v57 = vmax.f32 %v1727_v48, 0.0  ;;  %v5112_v41 = vld [vmem:[%s5299_s19 + $0x270] sm:$0xff]  }
 0x132   : > { %v2656_v56 = vmax.f32 %v1738_v52, 0.0  ;;  %4521 = vmatmul.mubr.msk.bf16.gmra.mrb[140].mxu0 %vm1175_vm1, %v5097_v47 }
 0x133   : > { %v2654_v58 = vmax.f32 %v1730_v54, 0.0  ;;  %4524 = vmatprep.mubr.msk.bf16.mxu0 %vm1175_vm1, %v5100_v50 }
 0x134   : > { %v5587_v34 = vpack.c.bf16 %v2656_v56, %v2655_v55  ;;  %4702 = vmatpush3.bf16.msra.mxu1 %v5531_v33  ;;  %v5113_v56 = vld [vmem:[%s5299_s19 + $0x278] sm:$0xff]  }
 0x135   : > { %v5593_v63 = vpack.c.bf16 %v2654_v58, %v2653_v57  ;;  %v4418_v0 = vpop.f32.mrb[36].mxu0 }
 0x136   : > { %v1751_v1 = vadd.f32 %v4418_v0, %v5484_v30  ;;  %v1742_v2 = vpop.f32.mrb[37].mxu0 }
 0x137   : > { %v1743_v4 = vadd.f32 %v5484_v30, %v1742_v2  ;;  %v4419_v5 = vpop.f32.mrb[38].mxu0  ;;  %3026 = vmatmul.mubr.f32.vlgmr.msra.gmra.mrb[60].mxu1 %v2884_v59  ;;  %v5114_v59 = vld [vmem:[%s5299_s19 + $0x280] sm:$0xff]  }
 0x138   : > { %v1754_v7 = vadd.f32 %v4419_v5, %v5484_v30  ;;  %v1745_v33 = vpop.f32.mrb[39].mxu0  ;;  %3095 = vmatprep.mubr.f32.mxu1 %v2896_v60  ;;  %v2659_v46 = vmax.f32 %v1751_v1, 0.0 }
 0x139   : > { %v1746_v8 = vadd.f32 %v5484_v30, %v1745_v33  ;;  %v2657_v10 = vmax.f32 %v1743_v4, 0.0 }
 0x13a   : > { %v2660_v9 = vmax.f32 %v1754_v7, 0.0  ;;  %4525 = vmatmul.mubr.msk.bf16.gmra.mrb[144].mxu0 %vm1175_vm1, %v5101_v3 }
 0x13b   : > { %v2658_v11 = vmax.f32 %v1746_v8, 0.0  ;;  %4528 = vmatprep.mubr.msk.bf16.mxu0 %vm1175_vm1, %v5104_v6 }
 0x13c   : > { %v5603_v12 = vpack.c.bf16 %v2660_v9, %v2659_v46  ;;  %v5115_v9 = vld [vmem:[%s5299_s19 + $0x288] sm:$0xff]  }
 0x13d   : > { %v5605_v15 = vpack.c.bf16 %v2658_v11, %v2657_v10  ;;  %v4422_v16 = vpop.f32.mrb[40].mxu0 }
 0x13e   : > { %v1767_v17 = vadd.f32 %v4422_v16, %v5484_v30  ;;  %v1758_v45 = vpop.f32.mrb[41].mxu0  ;;  %v5116_v16 = vld [vmem:[%s5299_s19 + $0x290] sm:$0xff]  }
 0x13f   : > { %v1759_v19 = vadd.f32 %v5484_v30, %v1758_v45  ;;  %v4423_v23 = vpop.f32.mrb[42].mxu0 }
 0x140   : > { %v1770_v25 = vadd.f32 %v4423_v23, %v5484_v30  ;;  %v1761_v26 = vpop.f32.mrb[43].mxu0  ;;  %v2663_v62 = vmax.f32 %v1767_v17, 0.0 }
 0x141   : > { %v1762_v27 = vadd.f32 %v5484_v30, %v1761_v26  ;;  %v2661_v29 = vmax.f32 %v1759_v19, 0.0 }
 0x142   : > { %v2664_v28 = vmax.f32 %v1770_v25, 0.0  ;;  %4529 = vmatmul.mubr.msk.bf16.gmra.mrb[148].mxu0 %vm1175_vm1, %v5105_v18 }
 0x143   : > { %v2662_v31 = vmax.f32 %v1762_v27, 0.0  ;;  %4532 = vmatprep.mubr.msk.bf16.mxu0 %vm1175_vm1, %v5108_v24 }
 0x144   : > { %v5615_v32 = vpack.c.bf16 %v2664_v28, %v2663_v62 }
 0x145   : > { %v5617_v35 = vpack.c.bf16 %v2662_v31, %v2661_v29  ;;  %v4426_v36 = vpop.f32.mrb[44].mxu0  ;;  %v5117_v29 = vld [vmem:[%s5299_s19 + $0x298] sm:$0xff]  }
 0x146   : > { %v1783_v37 = vadd.f32 %v4426_v36, %v5484_v30  ;;  %v1774_v61 = vpop.f32.mrb[45].mxu0 }
 0x147   : > { %v1775_v39 = vadd.f32 %v5484_v30, %v1774_v61  ;;  %v4427_v40 = vpop.f32.mrb[46].mxu0 }
 0x148   : > { %v1786_v42 = vadd.f32 %v4427_v40, %v5484_v30  ;;  %v1777_v43 = vpop.f32.mrb[47].mxu0  ;;  %v2667_v14 = vmax.f32 %v1783_v37, 0.0  ;;  %v5118_v37 = vld [vmem:[%s5299_s19 + $0x2a0] sm:$0xff]  }
 0x149   : > { %v1778_v44 = vadd.f32 %v5484_v30, %v1777_v43  ;;  %v2665_v48 = vmax.f32 %v1775_v39, 0.0 }
 0x14a   : > { %v2668_v47 = vmax.f32 %v1786_v42, 0.0  ;;  %4533 = vmatmul.mubr.msk.bf16.gmra.mrb[152].mxu0 %vm1175_vm1, %v5109_v38 }
 0x14b   : > { %v2666_v49 = vmax.f32 %v1778_v44, 0.0  ;;  %4536 = vmatprep.mubr.msk.bf16.mxu0 %vm1175_vm1, %v5112_v41 }
 0x14c   : > { %v5627_v50 = vpack.c.bf16 %v2668_v47, %v2667_v14 }
 0x14d   : > { %v5629_v52 = vpack.c.bf16 %v2666_v49, %v2665_v48  ;;  %v4430_v53 = vpop.f32.mrb[48].mxu0  ;;  %v5119_v48 = vld [vmem:[%s5299_s19 + $0x2a8] sm:$0xff]  }
 0x14e   : > { %v1799_v54 = vadd.f32 %v4430_v53, %v5484_v30  ;;  %v1790_v55 = vpop.f32.mrb[49].mxu0 }
 0x14f   : > { %v1791_v57 = vadd.f32 %v5484_v30, %v1790_v55  ;;  %v4431_v58 = vpop.f32.mrb[50].mxu0 }
 0x150   : > { %v1802_v60 = vadd.f32 %v4431_v58, %v5484_v30  ;;  %v1793_v0 = vpop.f32.mrb[51].mxu0  ;;  %v2671_v2 = vmax.f32 %v1799_v54, 0.0  ;;  %v5120_v54 = vld [vmem:[%s5299_s19 + $0x2b0] sm:$0xff]  }
 0x151   : > { %v1794_v1 = vadd.f32 %v5484_v30, %v1793_v0  ;;  %v2669_v4 = vmax.f32 %v1791_v57, 0.0 }
 0x152   : > { %v2672_v3 = vmax.f32 %v1802_v60, 0.0  ;;  %4537 = vmatmul.mubr.msk.bf16.gmra.mrb[156].mxu0 %vm1175_vm1, %v5113_v56 }
 0x153   : > { %v2670_v5 = vmax.f32 %v1794_v1, 0.0  ;;  %4540 = vmatprep.mubr.msk.bf16.mxu0 %vm1175_vm1, %v5114_v59 }
 0x154   : > { %v4707_v6 = vpack.c.bf16 %v2672_v3, %v2671_v2 }
 0x155   : > { %v4703_v7 = vpack.c.bf16 %v2670_v5, %v2669_v4  ;;  %v4434_v33 = vpop.f32.mrb[52].mxu0  ;;  %v5121_v4 = vld [vmem:[%s5299_s19 + $0x2b8] sm:$0xff]  }
 0x156   : > { %v1815_v8 = vadd.f32 %v4434_v33, %v5484_v30  ;;  %v1806_v46 = vpop.f32.mrb[53].mxu0  ;;  %v2891_v33 = vsub.s32 2, %v5457_v20 }
 0x157   : > { %v1807_v10 = vadd.f32 %v5484_v30, %v1806_v46  ;;  %v4435_v11 = vpop.f32.mrb[54].mxu0  ;;  %4704 = vmatprep.subr.bf16.mxu1 %v4703_v7  ;;  %v5122_v7 = vld [vmem:[%s5299_s19 + $0x2c0] sm:$0xff]  }
 0x158   : > { %v1818_v17 = vadd.f32 %v4435_v11, %v5484_v30  ;;  %v1809_v45 = vpop.f32.mrb[55].mxu0  ;;  %4706 = vmatpush3.bf16.msra.mxu1 %v5593_v63  ;;  %v2675_v19 = vmax.f32 %v1815_v8, 0.0 }
 0x159   : > { %v1810_v18 = vadd.f32 %v5484_v30, %v1809_v45  ;;  %4708 = vmatprep.subr.bf16.mxu1 %v4707_v6  ;;  %v2673_v24 = vmax.f32 %v1807_v10, 0.0  ;;  %v2892_v45 = vrot.slane %v5465_v22, %v2891_v33 }
 0x15a   : > { %v2676_v23 = vmax.f32 %v1818_v17, 0.0  ;;  %4541 = vmatmul.mubr.msk.bf16.gmra.mrb[160].mxu0 %vm1175_vm1, %v5115_v9 }
 0x15b   : > { %v2674_v25 = vmax.f32 %v1810_v18, 0.0  ;;  %4544 = vmatprep.mubr.msk.bf16.mxu0 %vm1175_vm1, %v5116_v16 }
 0x15c   : > { %v4715_v26 = vpack.c.bf16 %v2676_v23, %v2675_v19  ;;  %4710 = vmatpush3.bf16.msra.mxu1 %v5587_v34 }
 0x15d   : > { %v4711_v27 = vpack.c.bf16 %v2674_v25, %v2673_v24  ;;  %v4438_v62 = vpop.f32.mrb[56].mxu0 }
 0x15e   : > { %v1831_v28 = vadd.f32 %v4438_v62, %v5484_v30  ;;  %v1822_v63 = vpop.f32.mrb[57].mxu0 }
 0x15f   : > { %v1823_v31 = vadd.f32 %v5484_v30, %v1822_v63  ;;  %v4439_v36 = vpop.f32.mrb[58].mxu0  ;;  %4712 = vmatprep.subr.bf16.mxu1 %v4711_v27 }
 0x160   : > { %v1834_v61 = vadd.f32 %v4439_v36, %v5484_v30  ;;  %v1825_v38 = vpop.f32.mrb[59].mxu0  ;;  %4714 = vmatpush3.bf16.msra.mxu1 %v5605_v15  ;;  %v2679_v34 = vmax.f32 %v1831_v28, 0.0  ;;  %v5124_v28 = vld [vmem:[%s5299_s19 + $0x2d0] sm:$0xff]  }
 0x161   : > { %v1826_v39 = vadd.f32 %v5484_v30, %v1825_v38  ;;  %4716 = vmatprep.subr.bf16.mxu1 %v4715_v26  ;;  %v2677_v41 = vmax.f32 %v1823_v31, 0.0  ;;  %v5123_v26 = vld [vmem:[%s5299_s19 + $0x2c8] sm:$0xff]  }
 0x162   : > { %v2680_v40 = vmax.f32 %v1834_v61, 0.0  ;;  %4545 = vmatmul.mubr.msk.bf16.gmra.mrb[164].mxu0 %vm1175_vm1, %v5117_v29 }
 0x163   : > { %v2678_v42 = vmax.f32 %v1826_v39, 0.0  ;;  %4548 = vmatprep.mubr.msk.bf16.mxu0 %vm1175_vm1, %v5118_v37 }
 0x164   : > { %v4723_v43 = vpack.c.bf16 %v2680_v40, %v2679_v34  ;;  %4718 = vmatpush3.bf16.msra.mxu1 %v5603_v12 }
 0x165   : > { %v4719_v44 = vpack.c.bf16 %v2678_v42, %v2677_v41  ;;  %v4442_v14 = vpop.f32.mrb[60].mxu0  ;;  %v5125_v41 = vld [vmem:[%s5299_s19 + $0x2d8] sm:$0xff]  }
 0x166   : > { %v1847_v47 = vadd.f32 %v4442_v14, %v5484_v30  ;;  %v1838_v15 = vpop.f32.mrb[61].mxu0 }
 0x167   : > { %v1839_v49 = vadd.f32 %v5484_v30, %v1838_v15  ;;  %v4443_v53 = vpop.f32.mrb[62].mxu0  ;;  %4720 = vmatprep.subr.bf16.mxu1 %v4719_v44  ;;  %v5126_v44 = vld [vmem:[%s5299_s19 + $0x2e0] sm:$0xff]  }
 0x168   : > { %v1850_v55 = vadd.f32 %v4443_v53, %v5484_v30  ;;  %v1841_v56 = vpop.f32.mrb[63].mxu0  ;;  %4722 = vmatpush3.bf16.msra.mxu1 %v5617_v35  ;;  %v2683_v12 = vmax.f32 %v1847_v47, 0.0 }
 0x169   : > { %v1842_v57 = vadd.f32 %v5484_v30, %v1841_v56  ;;  %4724 = vmatprep.subr.bf16.mxu1 %v4723_v43  ;;  %v2681_v59 = vmax.f32 %v1839_v49, 0.0 }
 0x16a   : > { %v2684_v58 = vmax.f32 %v1850_v55, 0.0  ;;  %4549 = vmatmul.mubr.msk.bf16.gmra.mrb[168].mxu0 %vm1175_vm1, %v5119_v48 }
 0x16b   : > { %v2682_v60 = vmax.f32 %v1842_v57, 0.0  ;;  %4552 = vmatprep.mubr.msk.bf16.mxu0 %vm1175_vm1, %v5120_v54 }
 0x16c   : > { %v4731_v0 = vpack.c.bf16 %v2684_v58, %v2683_v12  ;;  %4726 = vmatpush3.bf16.msra.mxu1 %v5615_v32  ;;  %v2903_v32 = vsub.s32 5, %v5457_v20 }
 0x16d   : > { %v4727_v1 = vpack.c.bf16 %v2682_v60, %v2681_v59  ;;  %v4446_v2 = vpop.f32.mrb[64].mxu0  ;;  %v5127_v59 = vld [vmem:[%s5299_s19 + $0x2e8] sm:$0xff]  }
 0x16e   : > { %v1863_v3 = vadd.f32 %v4446_v2, %v5484_v30  ;;  %v1854_v35 = vpop.f32.mrb[65].mxu0  ;;  %v2904_v18 = vrot.slane %v5465_v22, %v2903_v32 }
 0x16f   : > { %v1855_v5 = vadd.f32 %v5484_v30, %v1854_v35  ;;  %v4447_v6 = vpop.f32.mrb[66].mxu0  ;;  %4728 = vmatprep.subr.bf16.mxu1 %v4727_v1  ;;  %v5128_v1 = vld [vmem:[%s5299_s19 + $0x2f0] sm:$0xff]  }
 0x170   : > { %v1866_v8 = vadd.f32 %v4447_v6, %v5484_v30  ;;  %v1857_v46 = vpop.f32.mrb[67].mxu0  ;;  %4730 = vmatpush3.bf16.msra.mxu1 %v5629_v52  ;;  %v2687_v10 = vmax.f32 %v1863_v3, 0.0 }
 0x171   : > { %v1858_v9 = vadd.f32 %v5484_v30, %v1857_v46  ;;  %4732 = vmatprep.subr.bf16.mxu1 %v4731_v0  ;;  %v2685_v16 = vmax.f32 %v1855_v5, 0.0 }
 0x172   : > { %v2688_v11 = vmax.f32 %v1866_v8, 0.0  ;;  %4553 = vmatmul.mubr.msk.bf16.gmra.mrb[172].mxu0 %vm1175_vm1, %v5121_v4 }
 0x173   : > { %v2686_v17 = vmax.f32 %v1858_v9, 0.0  ;;  %4556 = vmatprep.mubr.msk.bf16.mxu0 %vm1175_vm1, %v5122_v7 }
 0x174   : > { %v5683_v52 = vpack.c.bf16 %v2688_v11, %v2687_v10  ;;  %4734 = vmatpush3.bf16.msra.mxu1 %v5627_v50 }
 0x175   : > { %v5689_v19 = vpack.c.bf16 %v2686_v17, %v2685_v16  ;;  %v4450_v23 = vpop.f32.mrb[68].mxu0  ;;  %v5129_v16 = vld [vmem:[%s5299_s19 + $0x2f8] sm:$0xff]  }
 0x176   : > { %v1879_v24 = vadd.f32 %v4450_v23, %v5484_v30  ;;  %v1870_v25 = vpop.f32.mrb[69].mxu0 }
 0x177   : > { %v1871_v27 = vadd.f32 %v5484_v30, %v1870_v25  ;;  %v4451_v62 = vpop.f32.mrb[70].mxu0  ;;  %3096 = vmatmul.mubr.f32.vlgmr.msra.gmra.mrb[62].mxu1 %v2892_v45 }
 0x178   : > { %v1882_v63 = vadd.f32 %v4451_v62, %v5484_v30  ;;  %v1873_v50 = vpop.f32.mrb[71].mxu0  ;;  %3165 = vmatprep.mubr.f32.mxu1 %v2904_v18  ;;  %v2691_v29 = vmax.f32 %v1879_v24, 0.0  ;;  %v5130_v18 = vld [vmem:[%s5299_s19 + $0x300] sm:$0xff]  }
 0x179   : > { %v1874_v22 = vadd.f32 %v5484_v30, %v1873_v50  ;;  %v2689_v36 = vmax.f32 %v1871_v27, 0.0 }
 0x17a   : > { %v2692_v31 = vmax.f32 %v1882_v63, 0.0  ;;  %4557 = vmatmul.mubr.msk.bf16.gmra.mrb[176].mxu0 %vm1175_vm1, %v5123_v26 }
 0x17b   : > { %v2690_v37 = vmax.f32 %v1874_v22, 0.0  ;;  %4560 = vmatprep.mubr.msk.bf16.mxu0 %vm1175_vm1, %v5124_v28 }
 0x17c   : > { %v5699_v61 = vpack.c.bf16 %v2692_v31, %v2691_v29 }
 0x17d   : > { %v5701_v38 = vpack.c.bf16 %v2690_v37, %v2689_v36  ;;  %v4454_v39 = vpop.f32.mrb[72].mxu0  ;;  %v5131_v36 = vld [vmem:[%s5299_s19 + $0x308] sm:$0xff]   ;;  %s243_s19 = sand.u32 1, %s5189_s22  }
 0x17e   : > { %v1895_v34 = vadd.f32 %v4454_v39, %v5484_v30  ;;  %v1886_v40 = vpop.f32.mrb[73].mxu0  ;;  %s244_s29 = scalar_lea.vmem [#allocation2], %s243_s19  ;;  %s3610_s13 = scalar_lea.sflag [#allocation3], %s243_s19 }
 0x17f   : > { %v1887_v42 = vadd.f32 %v5484_v30, %v1886_v40  ;;  %v4455_v43 = vpop.f32.mrb[74].mxu0  ;;  %s3622_s9 = sshll.u32 %s244_s29, 4  ;;  %s6199_s9 = int_to_ptr.vmem [resolvable:$true] %s3622_s9 }
 0x180   : > { %v1898_v14 = vadd.f32 %v4455_v43, %v5484_v30  ;;  %v1889_v47 = vpop.f32.mrb[75].mxu0  ;;  %v2695_v48 = vmax.f32 %v1895_v34, 0.0  ;;  %s5135_s14 = scalar_lea.vmem %s6199_s9, 16  ;;  %p5142_p0 = scmp.lt.s32.totalorder %s6199_s9, %s5140_s15 }
 0x181   : > { %v1890_v15 = vadd.f32 %v5484_v30, %v1889_v47  ;;  %v2693_v53 = vmax.f32 %v1887_v42, 0.0  ;;  %p5136_p11 = scmp.ne.s32.totalorder %s6199_s9, %s5135_s14  ;;  %p5143_p1 = scmp.lt.s32.totalorder %s5141_s16, %s5135_s14 }
 0x182   : > { %v2696_v49 = vmax.f32 %v1898_v14, 0.0  ;;  %4561 = vmatmul.mubr.msk.bf16.gmra.mrb[180].mxu0 %vm1175_vm1, %v5125_v41 }
 0x183   : > { %v2694_v54 = vmax.f32 %v1890_v15, 0.0  ;;  %4564 = vmatprep.mubr.msk.bf16.mxu0 %vm1175_vm1, %v5126_v44  ;;  %p5137_p12 = pnand %p5136_p11, %p5276_p5  ;;  %p5144_p2 = por %p5143_p1, %p5142_p0 }
 0x184   : > { %v5711_v55 = vpack.c.bf16 %v2696_v49, %v2695_v48 }
 0x185   : > { %v5713_v56 = vpack.c.bf16 %v2694_v54, %v2693_v53  ;;  %v4458_v57 = vpop.f32.mrb[76].mxu0  ;;  %p5138_p13 = pneg %p5137_p12 }
 0x186   : > { %v1911_v12 = vadd.f32 %v4458_v57, %v5484_v30  ;;  %v1902_v58 = vpop.f32.mrb[77].mxu0 }
 0x187   : > { %v1903_v60 = vadd.f32 %v5484_v30, %v1902_v58  ;;  %v4459_v0 = vpop.f32.mrb[78].mxu0  ;;  %p5145_p3 = pnand %p5144_p2, %p5138_p13 }
 0x188   : > { %v1914_v2 = vadd.f32 %v4459_v0, %v5484_v30  ;;  %v1905_v3 = vpop.f32.mrb[79].mxu0  ;;  %v2699_v4 = vmax.f32 %v1911_v12, 0.0 }
 0x189   : > { %v1906_v35 = vadd.f32 %v5484_v30, %v1905_v3  ;;  %v2697_v6 = vmax.f32 %v1903_v60, 0.0 }
 0x18a   : > { %v2700_v5 = vmax.f32 %v1914_v2, 0.0  ;;  %4565 = vmatmul.mubr.msk.bf16.gmra.mrb[184].mxu0 %vm1175_vm1, %v5127_v59 }
 0x18b   : > { %v2698_v7 = vmax.f32 %v1906_v35, 0.0  ;;  %4568 = vmatprep.mubr.msk.bf16.mxu0 %vm1175_vm1, %v5128_v1 }
 0x18c   : > { %v5723_v8 = vpack.c.bf16 %v2700_v5, %v2699_v4 }
 0x18d   : > { %v5725_v46 = vpack.c.bf16 %v2698_v7, %v2697_v6  ;;  %v4462_v9 = vpop.f32.mrb[80].mxu0 }
 0x18e   : > { %v1927_v10 = vadd.f32 %v4462_v9, %v5484_v30  ;;  %v1918_v11 = vpop.f32.mrb[81].mxu0 }
 0x18f   : > { %v1919_v17 = vadd.f32 %v5484_v30, %v1918_v11  ;;  %v4463_v45 = vpop.f32.mrb[82].mxu0 }
 0x190   : > { %v1930_v23 = vadd.f32 %v4463_v45, %v5484_v30  ;;  %v1921_v24 = vpop.f32.mrb[83].mxu0  ;;  %v2703_v26 = vmax.f32 %v1927_v10, 0.0 }
 0x191   : > { %v1922_v25 = vadd.f32 %v5484_v30, %v1921_v24  ;;  %v2701_v62 = vmax.f32 %v1919_v17, 0.0 }
 0x192   : > { %v2704_v27 = vmax.f32 %v1930_v23, 0.0  ;;  %4569 = vmatmul.mubr.msk.bf16.gmra.mrb[188].mxu0 %vm1175_vm1, %v5129_v16 }
 0x193   : > { %v2702_v28 = vmax.f32 %v1922_v25, 0.0  ;;  %4572 = vmatprep.mubr.msk.bf16.mxu0 %vm1175_vm1, %v5130_v18 }
 0x194   : > { %v4739_v63 = vpack.c.bf16 %v2704_v27, %v2703_v26  ;;  %v6247_v27 = vsub.s32 7, %v5457_v20 }
 0x195   : > { %v4735_v50 = vpack.c.bf16 %v2702_v28, %v2701_v62  ;;  %v4466_v22 = vpop.f32.mrb[84].mxu0 }
 0x196   : > { %v1943_v29 = vadd.f32 %v4466_v22, %v5484_v30  ;;  %v1934_v31 = vpop.f32.mrb[85].mxu0 }
 0x197   : > { %v1935_v37 = vadd.f32 %v5484_v30, %v1934_v31  ;;  %v4467_v39 = vpop.f32.mrb[86].mxu0  ;;  %4736 = vmatprep.subr.bf16.mxu1 %v4735_v50 }
 0x198   : > { %v1946_v34 = vadd.f32 %v4467_v39, %v5484_v30  ;;  %v1937_v40 = vpop.f32.mrb[87].mxu0  ;;  %4738 = vmatpush3.bf16.msra.mxu1 %v5689_v19  ;;  %v2707_v42 = vmax.f32 %v1943_v29, 0.0  ;;  %v5765_v39 = vld [vmem:[%s6242_s3] sm:$0xff] }
 0x199   : > { %v1938_v41 = vadd.f32 %v5484_v30, %v1937_v40  ;;  %4740 = vmatprep.subr.bf16.mxu1 %v4739_v63  ;;  %v2705_v44 = vmax.f32 %v1935_v37, 0.0  ;;  %v4578_v63 = vpop.f32.mrb[0].mxu1 }
 0x19a   : > { %v2708_v43 = vmax.f32 %v1946_v34, 0.0  ;;  %4573 = vmatmul.mubr.msk.bf16.gmra.mrb[192].mxu0 %vm1175_vm1, %v5131_v36  ;;  %v2382_v50 = vpop.f32.mrb[1].mxu1 }
 0x19b   : > { %v2706_v14 = vmax.f32 %v1938_v41, 0.0  ;;  %v4579_v31 = vpop.f32.mrb[2].mxu1 }
 0x19c   : > { %v4747_v47 = vpack.c.bf16 %v2708_v43, %v2707_v42  ;;  %4742 = vmatpush3.bf16.msra.mxu1 %v5683_v52  ;;  %v2385_v40 = vpop.f32.mrb[3].mxu1  ;;  %v2391_v42 = vadd.f32 %v4578_v63, %v5484_v30  ;;  %v2383_v43 = vadd.f32 %v5484_v30, %v2382_v50 }
 0x19d   : > { %v4743_v15 = vpack.c.bf16 %v2706_v14, %v2705_v44  ;;  %v4470_v48 = vpop.f32.mrb[88].mxu0  ;;  %v2394_v44 = vadd.f32 %v4579_v31, %v5484_v30 }
 0x19e   : > { %v1959_v49 = vadd.f32 %v4470_v48, %v5484_v30  ;;  %v1950_v53 = vpop.f32.mrb[89].mxu0 }
 0x19f   : > { %v1951_v54 = vadd.f32 %v5484_v30, %v1950_v53  ;;  %v4471_v19 = vpop.f32.mrb[90].mxu0  ;;  %4744 = vmatprep.subr.bf16.mxu1 %v4743_v15  ;;  %v2386_v15 = vadd.f32 %v5484_v30, %v2385_v40  ;;  %v2819_v53 = vmax.f32 %v2391_v42, 0.0 }
 0x1a0   : > { %v1962_v57 = vadd.f32 %v4471_v19, %v5484_v30  ;;  %v1953_v12 = vpop.f32.mrb[91].mxu0  ;;  %4746 = vmatpush3.bf16.msra.mxu1 %v5701_v38  ;;  %v2711_v59 = vmax.f32 %v1959_v49, 0.0  ;;  %v2820_v19 = vmax.f32 %v2394_v44, 0.0 }
 0x1a1   : > { %v1954_v58 = vadd.f32 %v5484_v30, %v1953_v12  ;;  %4748 = vmatprep.subr.bf16.mxu1 %v4747_v47  ;;  %v2709_v52 = vmax.f32 %v1951_v54, 0.0  ;;  %v2817_v54 = vmax.f32 %v2383_v43, 0.0 }
 0x1a2   : > { %v2712_v60 = vmax.f32 %v1962_v57, 0.0 }
 0x1a3   : > { %v2710_v0 = vmax.f32 %v1954_v58, 0.0  ;;  %v2818_v58 = vmax.f32 %v2386_v15, 0.0 }
 0x1a4   : > { %v4755_v1 = vpack.c.bf16 %v2712_v60, %v2711_v59  ;;  %4750 = vmatpush3.bf16.msra.mxu1 %v5699_v61 }
 0x1a5   : > { %v4751_v2 = vpack.c.bf16 %v2710_v0, %v2709_v52  ;;  %v4474_v3 = vpop.f32.mrb[92].mxu0  ;;  %v5790_v52 = vpack.c.bf16 %v2820_v19, %v2819_v53 }
 0x1a6   : > { %v1975_v35 = vadd.f32 %v4474_v3, %v5484_v30  ;;  %v1966_v4 = vpop.f32.mrb[93].mxu0 }
 0x1a7   : > { %v1967_v5 = vadd.f32 %v5484_v30, %v1966_v4  ;;  %v4475_v6 = vpop.f32.mrb[94].mxu0  ;;  %4752 = vmatprep.subr.bf16.mxu1 %v4751_v2 }
 0x1a8   : > { %v1978_v38 = vadd.f32 %v4475_v6, %v5484_v30  ;;  %v1969_v7 = vpop.f32.mrb[95].mxu0  ;;  %4754 = vmatpush3.bf16.msra.mxu1 %v5713_v56  ;;  %v2715_v10 = vmax.f32 %v1975_v35, 0.0  ;;  %v2899_v56 = vsub.s32 4, %v5457_v20 }
 0x1a9   : > { %v1970_v9 = vadd.f32 %v5484_v30, %v1969_v7  ;;  %4756 = vmatprep.subr.bf16.mxu1 %v4755_v1  ;;  %v2713_v61 = vmax.f32 %v1967_v5, 0.0  ;;  %v5793_v1 = vpack.c.bf16 %v2818_v58, %v2817_v54 }
 0x1aa   : > { %v2716_v11 = vmax.f32 %v1978_v38, 0.0  ;;  %v2900_v34 = vrot.slane %v5765_v39, %v2899_v56 }
 0x1ab   : > { %v2714_v16 = vmax.f32 %v1970_v9, 0.0 }
 0x1ac   : > { %v4763_v17 = vpack.c.bf16 %v2716_v11, %v2715_v10  ;;  %4758 = vmatpush3.bf16.msra.mxu1 %v5711_v55 }
 0x1ad   : > { %v4759_v45 = vpack.c.bf16 %v2714_v16, %v2713_v61  ;;  %v4478_v18 = vpop.f32.mrb[96].mxu0 }
 0x1ae   : > { %v1991_v23 = vadd.f32 %v4478_v18, %v5484_v30  ;;  %v1982_v24 = vpop.f32.mrb[97].mxu0 }
 0x1af   : > { %v1983_v25 = vadd.f32 %v5484_v30, %v1982_v24  ;;  %v4479_v26 = vpop.f32.mrb[98].mxu0  ;;  %4760 = vmatprep.subr.bf16.mxu1 %v4759_v45 }
 0x1b0   : > { %v1994_v62 = vadd.f32 %v4479_v26, %v5484_v30  ;;  %v1985_v28 = vpop.f32.mrb[99].mxu0  ;;  %4762 = vmatpush3.bf16.msra.mxu1 %v5725_v46  ;;  %v2719_v22 = vmax.f32 %v1991_v23, 0.0  ;;  %v2912_v46 = vrot.slane %v5765_v39, %v6247_v27 }
 0x1b1   : > { %v1986_v55 = vadd.f32 %v5484_v30, %v1985_v28  ;;  %4764 = vmatprep.subr.bf16.mxu1 %v4763_v17  ;;  %v2717_v36 = vmax.f32 %v1983_v25, 0.0 }
 0x1b2   : > { %v2720_v29 = vmax.f32 %v1994_v62, 0.0 }
 0x1b3   : > { %v2718_v37 = vmax.f32 %v1986_v55, 0.0 }
 0x1b4   : > { %v5773_v41 = vpack.c.bf16 %v2720_v29, %v2719_v22  ;;  %4766 = vmatpush3.bf16.msra.mxu1 %v5723_v8  ;;  %v5786_v8 = vld [vmem:[%s6241_s2] ss:$0 sm:$0xff] }
 0x1b5   : > { %v5779_v14 = vpack.c.bf16 %v2718_v37, %v2717_v36  ;;  %v4482_v47 = vpop.f32.mrb[100].mxu0 }
 0x1b6   : > { %v2007_v48 = vadd.f32 %v4482_v47, %v5484_v30  ;;  %v1998_v49 = vpop.f32.mrb[101].mxu0  ;;  %v4582_v30 = vpop.f32.mrb[4].mxu1 }
 0x1b7   : > { %v1999_v57 = vadd.f32 %v5786_v8, %v1998_v49  ;;  %v4483_v12 = vpop.f32.mrb[102].mxu0  ;;  %3166 = vmatmul.mubr.f32.vlgmr.msra.gmra.mrb[64].mxu1 %v2900_v34  ;;  %v2398_v2 = vpop.f32.mrb[5].mxu1  ;;  %v2407_v9 = vadd.f32 %v5786_v8, %v4582_v30 }
 0x1b8   : > { %v2010_v59 = vadd.f32 %v5786_v8, %v4483_v12  ;;  %v2001_v60 = vpop.f32.mrb[103].mxu0  ;;  %3235 = vmatprep.mubr.f32.mxu1 %v2912_v46  ;;  %v2723_v3 = vmax.f32 %v2007_v48, 0.0  ;;  %v4583_v4 = vpop.f32.mrb[6].mxu1  ;;  %v2399_v10 = vadd.f32 %v5786_v8, %v2398_v2 }
 0x1b9   : > { %v2002_v0 = vadd.f32 %v5786_v8, %v2001_v60  ;;  %v2721_v5 = vmax.f32 %v1999_v57, 0.0  ;;  %v2401_v38 = vpop.f32.mrb[7].mxu1  ;;  %v2410_v11 = vadd.f32 %v5786_v8, %v4583_v4  ;;  %v2823_v23 = vmax.f32 %v2407_v9, 0.0 }
 0x1ba   : > { %v2724_v35 = vmax.f32 %v2010_v59, 0.0  ;;  %v2402_v17 = vadd.f32 %v5786_v8, %v2401_v38  ;;  %v2821_v24 = vmax.f32 %v2399_v10, 0.0  ;;  %v4586_v22 = vpop.f32.mrb[8].mxu1 }
 0x1bb   : > { %v2722_v6 = vmax.f32 %v2002_v0, 0.0  ;;  %v2824_v25 = vmax.f32 %v2410_v11, 0.0  ;;  %v2414_v36 = vpop.f32.mrb[9].mxu1  ;;  %v2423_v47 = vadd.f32 %v5786_v8, %v4586_v22 }
 0x1bc   : > { %v5795_v7 = vpack.c.bf16 %v2724_v35, %v2723_v3  ;;  %v2822_v28 = vmax.f32 %v2402_v17, 0.0  ;;  %v4587_v46 = vpop.f32.mrb[10].mxu1  ;;  %v2415_v15 = vadd.f32 %v5786_v8, %v2414_v36 }
 0x1bd   : > { %v5800_v61 = vpack.c.bf16 %v2722_v6, %v2721_v5  ;;  %v4486_v16 = vpop.f32.mrb[104].mxu0  ;;  %v5806_v50 = vpack.c.bf16 %v2824_v25, %v2823_v23  ;;  %v2417_v43 = vpop.f32.mrb[11].mxu1  ;;  %v2426_v48 = vadd.f32 %v5786_v8, %v4587_v46  ;;  %v2827_v12 = vmax.f32 %v2423_v47, 0.0 }
 0x1be   : > { %v2023_v45 = vadd.f32 %v5786_v8, %v4486_v16  ;;  %v2014_v18 = vpop.f32.mrb[105].mxu0  ;;  %v5809_v31 = vpack.c.bf16 %v2822_v28, %v2821_v24  ;;  %v2418_v54 = vadd.f32 %v5786_v8, %v2417_v43  ;;  %v2825_v58 = vmax.f32 %v2415_v15, 0.0  ;;  %v4590_v4 = vpop.f32.mrb[12].mxu1 }
 0x1bf   : > { %v2015_v26 = vadd.f32 %v5786_v8, %v2014_v18  ;;  %v4487_v62 = vpop.f32.mrb[106].mxu0  ;;  %v2828_v59 = vmax.f32 %v2426_v48, 0.0  ;;  %v2430_v38 = vpop.f32.mrb[13].mxu1  ;;  %v2439_v23 = vadd.f32 %v5786_v8, %v4590_v4 }
 0x1c0   : > { %v2026_v63 = vadd.f32 %v5786_v8, %v4487_v62  ;;  %v2017_v55 = vpop.f32.mrb[107].mxu0  ;;  %v2727_v37 = vmax.f32 %v2023_v45, 0.0  ;;  %v2826_v0 = vmax.f32 %v2418_v54, 0.0  ;;  %v4591_v11 = vpop.f32.mrb[14].mxu1  ;;  %v2431_v24 = vadd.f32 %v5786_v8, %v2430_v38 }
 0x1c1   : > { %v2018_v29 = vadd.f32 %v5786_v8, %v2017_v55  ;;  %v2725_v40 = vmax.f32 %v2015_v26, 0.0  ;;  %v5822_v35 = vpack.c.bf16 %v2828_v59, %v2827_v12  ;;  %v2433_v45 = vpop.f32.mrb[15].mxu1  ;;  %v2442_v25 = vadd.f32 %v5786_v8, %v4591_v11 }
 0x1c2   : > { %v2728_v34 = vmax.f32 %v2026_v63, 0.0  ;;  %v5825_v6 = vpack.c.bf16 %v2826_v0, %v2825_v58  ;;  %v2434_v28 = vadd.f32 %v5786_v8, %v2433_v45  ;;  %v2831_v22 = vmax.f32 %v2439_v23, 0.0  ;;  %v4594_v47 = vpop.f32.mrb[16].mxu1 }
 0x1c3   : > { %v2726_v42 = vmax.f32 %v2018_v29, 0.0  ;;  %v2829_v29 = vmax.f32 %v2431_v24, 0.0  ;;  %v2832_v36 = vmax.f32 %v2442_v25, 0.0 }
 0x1c4   : > { %v5811_v44 = vpack.c.bf16 %v2728_v34, %v2727_v37  ;;  %v2830_v46 = vmax.f32 %v2434_v28, 0.0 }
 0x1c5   : > { %v5816_v49 = vpack.c.bf16 %v2726_v42, %v2725_v40  ;;  %v4490_v53 = vpop.f32.mrb[108].mxu0  ;;  %v5838_v43 = vpack.c.bf16 %v2832_v36, %v2831_v22 }
 0x1c6   : > { %v2039_v19 = vadd.f32 %v5786_v8, %v4490_v53  ;;  %v2030_v57 = vpop.f32.mrb[109].mxu0  ;;  %v5841_v48 = vpack.c.bf16 %v2830_v46, %v2829_v29  ;;  %v2446_v53 = vpop.f32.mrb[17].mxu1 }
 0x1c7   : > { %v2031_v60 = vadd.f32 %v5786_v8, %v2030_v57  ;;  %v4491_v30 = vpop.f32.mrb[110].mxu0  ;;  %v4595_v57 = vpop.f32.mrb[18].mxu1  ;;  %v2447_v0 = vadd.f32 %v5786_v8, %v2446_v53 }
 0x1c8   : > { %v2042_v2 = vadd.f32 %v5786_v8, %v4491_v30  ;;  %v2033_v3 = vpop.f32.mrb[111].mxu0  ;;  %v2731_v9 = vmax.f32 %v2039_v19, 0.0  ;;  %v2449_v59 = vpop.f32.mrb[19].mxu1  ;;  %v2455_v30 = vadd.f32 %v5786_v8, %v4594_v47 }
 0x1c9   : > { %v2034_v5 = vadd.f32 %v5786_v8, %v2033_v3  ;;  %v2729_v16 = vmax.f32 %v2031_v60, 0.0  ;;  %v2833_v11 = vmax.f32 %v2447_v0, 0.0  ;;  %v4598_v28 = vpop.f32.mrb[20].mxu1 }
 0x1ca   : > { %v2732_v10 = vmax.f32 %v2042_v2, 0.0  ;;  %v2458_v2 = vadd.f32 %v5786_v8, %v4595_v57  ;;  %v2462_v22 = vpop.f32.mrb[21].mxu1 }
 0x1cb   : > { %v2730_v17 = vmax.f32 %v2034_v5, 0.0  ;;  %v2450_v5 = vadd.f32 %v5786_v8, %v2449_v59  ;;  %v2463_v47 = vadd.f32 %v5786_v8, %v2462_v22 }
 0x1cc   : > { %v5827_v18 = vpack.c.bf16 %v2732_v10, %v2731_v9  ;;  %v2835_v10 = vmax.f32 %v2455_v30, 0.0 }
 0x1cd   : > { %v5832_v26 = vpack.c.bf16 %v2730_v17, %v2729_v16  ;;  %v4494_v62 = vpop.f32.mrb[112].mxu0  ;;  %v2836_v16 = vmax.f32 %v2458_v2, 0.0  ;;  %v2834_v23 = vmax.f32 %v2450_v5, 0.0  ;;  %v2837_v59 = vmax.f32 %v2463_v47, 0.0 }
 0x1ce   : > { %v2055_v63 = vadd.f32 %v5786_v8, %v4494_v62  ;;  %v2046_v55 = vpop.f32.mrb[113].mxu0 }
 0x1cf   : > { %v2047_v37 = vadd.f32 %v5786_v8, %v2046_v55  ;;  %v4495_v34 = vpop.f32.mrb[114].mxu0  ;;  %v5851_v62 = vpack.c.bf16 %v2836_v16, %v2835_v10  ;;  %v5854_v55 = vpack.c.bf16 %v2834_v23, %v2833_v11 }
 0x1d0   : > { %v2058_v40 = vadd.f32 %v5786_v8, %v4495_v34  ;;  %v2049_v42 = vpop.f32.mrb[115].mxu0  ;;  %v2735_v54 = vmax.f32 %v2055_v63, 0.0 }
 0x1d1   : > { %v2050_v15 = vadd.f32 %v5786_v8, %v2049_v42  ;;  %v2733_v12 = vmax.f32 %v2047_v37, 0.0  ;;  %v4599_v37 = vpop.f32.mrb[22].mxu1 }
 0x1d2   : > { %v2736_v19 = vmax.f32 %v2058_v40, 0.0  ;;  %v2465_v40 = vpop.f32.mrb[23].mxu1 }
 0x1d3   : > { %v2734_v58 = vmax.f32 %v2050_v15, 0.0  ;;  %v2474_v15 = vadd.f32 %v5786_v8, %v4599_v37  ;;  %v4602_v5 = vpop.f32.mrb[24].mxu1 }
 0x1d4   : > { %v4771_v60 = vpack.c.bf16 %v2736_v19, %v2735_v54  ;;  %v2466_v19 = vadd.f32 %v5786_v8, %v2465_v40  ;;  %v2478_v10 = vpop.f32.mrb[25].mxu1 }
 0x1d5   : > { %v4767_v3 = vpack.c.bf16 %v2734_v58, %v2733_v12  ;;  %v4498_v4 = vpop.f32.mrb[116].mxu0 }
 0x1d6   : > { %v2071_v38 = vadd.f32 %v5786_v8, %v4498_v4  ;;  %v2062_v9 = vpop.f32.mrb[117].mxu0 }
 0x1d7   : > { %v2063_v17 = vadd.f32 %v5786_v8, %v2062_v9  ;;  %v4499_v45 = vpop.f32.mrb[118].mxu0  ;;  %4768 = vmatprep.subr.bf16.mxu1 %v4767_v3 }
 0x1d8   : > { %v2074_v24 = vadd.f32 %v5786_v8, %v4499_v45  ;;  %v2065_v25 = vpop.f32.mrb[119].mxu0  ;;  %4770 = vmatpush3.bf16.msra.mxu1 %v5779_v14  ;;  %v2739_v29 = vmax.f32 %v2071_v38, 0.0  ;;  %v2471_v14 = vadd.f32 %v5786_v8, %v4598_v28  ;;  %v2479_v28 = vadd.f32 %v5786_v8, %v2478_v10 }
 0x1d9   : > { %v2066_v63 = vadd.f32 %v5786_v8, %v2065_v25  ;;  %4772 = vmatprep.subr.bf16.mxu1 %v4771_v60  ;;  %v2737_v34 = vmax.f32 %v2063_v17, 0.0  ;;  %v2840_v60 = vmax.f32 %v2474_v15, 0.0  ;;  %v4603_v17 = vpop.f32.mrb[26].mxu1 }
 0x1da   : > { %v2740_v36 = vmax.f32 %v2074_v24, 0.0  ;;  %v2839_v58 = vmax.f32 %v2471_v14, 0.0  ;;  %v2481_v24 = vpop.f32.mrb[27].mxu1  ;;  %v2841_v40 = vmax.f32 %v2479_v28, 0.0 }
 0x1db   : > { %v2738_v46 = vmax.f32 %v2066_v63, 0.0  ;;  %v2490_v63 = vadd.f32 %v5786_v8, %v4603_v17 }
 0x1dc   : > { %v4779_v42 = vpack.c.bf16 %v2740_v36, %v2739_v29  ;;  %4774 = vmatpush3.bf16.msra.mxu1 %v5773_v41  ;;  %v2838_v41 = vmax.f32 %v2466_v19, 0.0  ;;  %v5865_v4 = vpack.c.bf16 %v2840_v60, %v2839_v58  ;;  %v2482_v36 = vadd.f32 %v5786_v8, %v2481_v24  ;;  %v4606_v19 = vpop.f32.mrb[28].mxu1 }
 0x1dd   : > { %v4775_v53 = vpack.c.bf16 %v2738_v46, %v2737_v34  ;;  %v4502_v54 = vpop.f32.mrb[120].mxu0  ;;  %v2494_v58 = vpop.f32.mrb[29].mxu1 }
 0x1de   : > { %v2087_v57 = vadd.f32 %v5786_v8, %v4502_v54  ;;  %v2078_v12 = vpop.f32.mrb[121].mxu0  ;;  %v5868_v9 = vpack.c.bf16 %v2838_v41, %v2837_v59 }
 0x1df   : > { %v2079_v30 = vadd.f32 %v5786_v8, %v2078_v12  ;;  %v4503_v0 = vpop.f32.mrb[122].mxu0  ;;  %4776 = vmatprep.subr.bf16.mxu1 %v4775_v53 }
 0x1e0   : > { %v2090_v2 = vadd.f32 %v5786_v8, %v4503_v0  ;;  %v2081_v3 = vpop.f32.mrb[123].mxu0  ;;  %4778 = vmatpush3.bf16.msra.mxu1 %v5800_v61  ;;  %v2743_v11 = vmax.f32 %v2087_v57, 0.0  ;;  %v2487_v61 = vadd.f32 %v5786_v8, %v4602_v5  ;;  %v2495_v5 = vadd.f32 %v5786_v8, %v2494_v58 }
 0x1e1   : > { %v2082_v38 = vadd.f32 %v5786_v8, %v2081_v3  ;;  %4780 = vmatprep.subr.bf16.mxu1 %v4779_v42  ;;  %v2741_v45 = vmax.f32 %v2079_v30, 0.0  ;;  %v2844_v42 = vmax.f32 %v2490_v63, 0.0  ;;  %v4607_v30 = vpop.f32.mrb[30].mxu1 }
 0x1e2   : > { %v2744_v16 = vmax.f32 %v2090_v2, 0.0  ;;  %v2843_v46 = vmax.f32 %v2487_v61, 0.0  ;;  %v2497_v2 = vpop.f32.mrb[31].mxu1  ;;  %v2845_v24 = vmax.f32 %v2495_v5, 0.0 }
 0x1e3   : > { %v2742_v23 = vmax.f32 %v2082_v38, 0.0  ;;  %v2506_v38 = vadd.f32 %v5786_v8, %v4607_v30 }
 0x1e4   : > { %v4787_v25 = vpack.c.bf16 %v2744_v16, %v2743_v11  ;;  %4782 = vmatpush3.bf16.msra.mxu1 %v5795_v7  ;;  %v2842_v7 = vmax.f32 %v2482_v36, 0.0  ;;  %v5879_v54 = vpack.c.bf16 %v2844_v42, %v2843_v46  ;;  %v2498_v16 = vadd.f32 %v5786_v8, %v2497_v2  ;;  %v5897_v36 = vld [vmem:[%s6242_s3 + $0x8] sm:$0xff] }
 0x1e5   : > { %v4783_v22 = vpack.c.bf16 %v2742_v23, %v2741_v45  ;;  %v4506_v29 = vpop.f32.mrb[124].mxu0 }
 0x1e6   : > { %v2103_v37 = vadd.f32 %v5786_v8, %v4506_v29  ;;  %v2094_v34 = vpop.f32.mrb[125].mxu0  ;;  %v5882_v12 = vpack.c.bf16 %v2842_v7, %v2841_v40  ;;  %v2846_v63 = vmax.f32 %v2498_v16, 0.0 }
 0x1e7   : > { %v2095_v14 = vadd.f32 %v5786_v8, %v2094_v34  ;;  %v4507_v47 = vpop.f32.mrb[126].mxu0  ;;  %4784 = vmatprep.subr.bf16.mxu1 %v4783_v22  ;;  %v4610_v34 = vpop.f32.mrb[32].mxu1 }
 0x1e8   : > { %v2106_v15 = vadd.f32 %v5786_v8, %v4507_v47  ;;  %v2097_v53 = vpop.f32.mrb[127].mxu0  ;;  %4786 = vmatpush3.bf16.msra.mxu1 %v5816_v49  ;;  %v2747_v59 = vmax.f32 %v2103_v37, 0.0  ;;  %v2503_v49 = vadd.f32 %v5786_v8, %v4606_v19  ;;  %v5902_v40 = vpack.c.bf16 %v2846_v63, %v2845_v24  ;;  %v2510_v42 = vpop.f32.mrb[33].mxu1 }
 0x1e9   : > { %v2098_v57 = vadd.f32 %v5786_v8, %v2097_v53  ;;  %4788 = vmatprep.subr.bf16.mxu1 %v4787_v25  ;;  %v2745_v0 = vmax.f32 %v2095_v14, 0.0  ;;  %v2848_v25 = vmax.f32 %v2506_v38, 0.0  ;;  %v4611_v7 = vpop.f32.mrb[34].mxu1  ;;  %v2920_v19 = vrot.slane %v5897_v36, %v2887_v21 }
 0x1ea   : > { %v2748_v60 = vmax.f32 %v2106_v15, 0.0  ;;  %v2847_v23 = vmax.f32 %v2503_v49, 0.0  ;;  %v2522_v30 = vadd.f32 %v5786_v8, %v4611_v7 }
 0x1eb   : > { %v2746_v41 = vmax.f32 %v2098_v57, 0.0  ;;  %v2513_v57 = vpop.f32.mrb[35].mxu1 }
 0x1ec   : > { %v4795_v3 = vpack.c.bf16 %v2748_v60, %v2747_v59  ;;  %4790 = vmatpush3.bf16.msra.mxu1 %v5811_v44  ;;  %v6246_v44 = vsub.s32 6, %v5457_v20  ;;  %v5899_v37 = vpack.c.bf16 %v2848_v25, %v2847_v23  ;;  %v2519_v59 = vadd.f32 %v5786_v8, %v4610_v34 }
 0x1ed   : > { %v4791_v10 = vpack.c.bf16 %v2746_v41, %v2745_v0  ;;  %v4510_v11 = vpop.f32.mrb[128].mxu0  ;;  %v2511_v60 = vadd.f32 %v5786_v8, %v2510_v42  ;;  %v2852_v5 = vmax.f32 %v2522_v30, 0.0 }
 0x1ee   : > { %v2119_v17 = vadd.f32 %v5786_v8, %v4510_v11  ;;  %v2110_v45 = vpop.f32.mrb[129].mxu0  ;;  %v2851_v21 = vmax.f32 %v2519_v59, 0.0  ;;  %v4614_v11 = vpop.f32.mrb[36].mxu1 }
 0x1ef   : > { %v2111_v61 = vadd.f32 %v5786_v8, %v2110_v45  ;;  %v4511_v28 = vpop.f32.mrb[130].mxu0  ;;  %4792 = vmatprep.subr.bf16.mxu1 %v4791_v10  ;;  %v2849_v49 = vmax.f32 %v2511_v60, 0.0  ;;  %v2535_v23 = vadd.f32 %v5786_v8, %v4614_v11  ;;  %v2526_v24 = vpop.f32.mrb[37].mxu1 }
 0x1f0   : > { %v2122_v22 = vadd.f32 %v5786_v8, %v4511_v28  ;;  %v2113_v29 = vpop.f32.mrb[131].mxu0  ;;  %4794 = vmatpush3.bf16.msra.mxu1 %v5832_v26  ;;  %v2751_v14 = vmax.f32 %v2119_v17, 0.0  ;;  %v2908_v26 = vrot.slane %v5765_v39, %v6246_v44  ;;  %v2514_v39 = vadd.f32 %v5786_v8, %v2513_v57  ;;  %v4615_v63 = vpop.f32.mrb[38].mxu1 }
 0x1f1   : > { %v2114_v46 = vadd.f32 %v5786_v8, %v2113_v29  ;;  %4796 = vmatprep.subr.bf16.mxu1 %v4795_v3  ;;  %v2749_v15 = vmax.f32 %v2111_v61, 0.0  ;;  %v5922_v45 = vpack.c.bf16 %v2852_v5, %v2851_v21  ;;  %v2527_v28 = vadd.f32 %v5786_v8, %v2526_v24  ;;  %v2529_v42 = vpop.f32.mrb[39].mxu1 }
 0x1f2   : > { %v2752_v47 = vmax.f32 %v2122_v22, 0.0  ;;  %v2850_v10 = vmax.f32 %v2514_v39, 0.0  ;;  %v2855_v34 = vmax.f32 %v2535_v23, 0.0  ;;  %v4618_v60 = vpop.f32.mrb[40].mxu1 }
 0x1f3   : > { %v2750_v53 = vmax.f32 %v2114_v46, 0.0  ;;  %v2538_v46 = vadd.f32 %v5786_v8, %v4615_v63  ;;  %v2853_v7 = vmax.f32 %v2527_v28, 0.0 }
 0x1f4   : > { %v5910_v58 = vpack.c.bf16 %v2752_v47, %v2751_v14  ;;  %4798 = vmatpush3.bf16.msra.mxu1 %v5827_v18  ;;  %v5926_v61 = vpack.c.bf16 %v2850_v10, %v2849_v49 }
 0x1f5   : > { %v5916_v0 = vpack.c.bf16 %v2750_v53, %v2749_v15  ;;  %v4514_v41 = vpop.f32.mrb[132].mxu0  ;;  %v2530_v15 = vadd.f32 %v5786_v8, %v2529_v42 }
 0x1f6   : > { %v2135_v2 = vadd.f32 %v5786_v8, %v4514_v41  ;;  %v2126_v3 = vpop.f32.mrb[133].mxu0 }
 0x1f7   : > { %v2127_v38 = vadd.f32 %v5786_v8, %v2126_v3  ;;  %v4515_v18 = vpop.f32.mrb[134].mxu0  ;;  %3236 = vmatmul.mubr.f32.vlgmr.msra.gmra.mrb[66].mxu1 %v2908_v26  ;;  %v2856_v26 = vmax.f32 %v2538_v46, 0.0  ;;  %v2854_v59 = vmax.f32 %v2530_v15, 0.0 }
 0x1f8   : > { %v2138_v16 = vadd.f32 %v5786_v8, %v4515_v18  ;;  %v2129_v17 = vpop.f32.mrb[135].mxu0  ;;  %3305 = vmatprep.mubr.f32.mxu1 %v2920_v19  ;;  %v2755_v22 = vmax.f32 %v2135_v2, 0.0  ;;  %v2551_v2 = vadd.f32 %v5786_v8, %v4618_v60  ;;  %v2542_v18 = vpop.f32.mrb[41].mxu1 }
 0x1f9   : > { %v2130_v25 = vadd.f32 %v5786_v8, %v2129_v17  ;;  %v2753_v14 = vmax.f32 %v2127_v38, 0.0  ;;  %v5936_v39 = vpack.c.bf16 %v2856_v26, %v2855_v34  ;;  %v5940_v49 = vpack.c.bf16 %v2854_v59, %v2853_v7 }
 0x1fa   : > { %v2756_v29 = vmax.f32 %v2138_v16, 0.0  ;;  %v2543_v11 = vadd.f32 %v5786_v8, %v2542_v18  ;;  %v4619_v16 = vpop.f32.mrb[42].mxu1  ;;  %v2859_v24 = vmax.f32 %v2551_v2, 0.0 }
 0x1fb   : > { %v2754_v47 = vmax.f32 %v2130_v25, 0.0  ;;  %v2554_v25 = vadd.f32 %v5786_v8, %v4619_v16  ;;  %v2545_v28 = vpop.f32.mrb[43].mxu1 }
 0x1fc   : > { %v5931_v53 = vpack.c.bf16 %v2756_v29, %v2755_v22  ;;  %v2857_v29 = vmax.f32 %v2543_v11, 0.0  ;;  %v2546_v34 = vadd.f32 %v5786_v8, %v2545_v28  ;;  %v4622_v15 = vpop.f32.mrb[44].mxu1 }
 0x1fd   : > { %v5933_v19 = vpack.c.bf16 %v2754_v47, %v2753_v14  ;;  %v4518_v57 = vpop.f32.mrb[136].mxu0  ;;  %v2860_v42 = vmax.f32 %v2554_v25, 0.0  ;;  %v2567_v60 = vadd.f32 %v5786_v8, %v4622_v15 }
 0x1fe   : > { %v2151_v30 = vadd.f32 %v5786_v8, %v4518_v57  ;;  %v2142_v41 = vpop.f32.mrb[137].mxu0  ;;  %v2858_v7 = vmax.f32 %v2546_v34, 0.0 }
 0x1ff   : > { %v2143_v3 = vadd.f32 %v5786_v8, %v2142_v41  ;;  %v4519_v21 = vpop.f32.mrb[138].mxu0  ;;  %v5952_v59 = vpack.c.bf16 %v2860_v42, %v2859_v24 }
 0x200   : > { %v2154_v5 = vadd.f32 %v5786_v8, %v4519_v21  ;;  %v2145_v38 = vpop.f32.mrb[139].mxu0  ;;  %v2759_v17 = vmax.f32 %v2151_v30, 0.0  ;;  %v5956_v2 = vpack.c.bf16 %v2858_v7, %v2857_v29 }
 0x201   : > { %v2146_v10 = vadd.f32 %v5786_v8, %v2145_v38  ;;  %v2757_v63 = vmax.f32 %v2143_v3, 0.0 }
 0x202   : > { %v2760_v23 = vmax.f32 %v2154_v5, 0.0  ;;  %v2558_v5 = vpop.f32.mrb[45].mxu1 }
 0x203   : > { %v2758_v22 = vmax.f32 %v2146_v10, 0.0  ;;  %v2559_v18 = vadd.f32 %v5786_v8, %v2558_v5  ;;  %v4623_v10 = vpop.f32.mrb[46].mxu1 }
 0x204   : > { %v5947_v46 = vpack.c.bf16 %v2760_v23, %v2759_v17  ;;  %v2863_v17 = vmax.f32 %v2567_v60, 0.0  ;;  %v2570_v23 = vadd.f32 %v5786_v8, %v4623_v10  ;;  %v2561_v24 = vpop.f32.mrb[47].mxu1 }
 0x205   : > { %v5949_v14 = vpack.c.bf16 %v2758_v22, %v2757_v63  ;;  %v4522_v47 = vpop.f32.mrb[140].mxu0  ;;  %v2861_v63 = vmax.f32 %v2559_v18, 0.0  ;;  %v2562_v22 = vadd.f32 %v5786_v8, %v2561_v24  ;;  %v4626_v15 = vpop.f32.mrb[48].mxu1 }
 0x206   : > { %v2167_v26 = vadd.f32 %v5786_v8, %v4522_v47  ;;  %v2158_v57 = vpop.f32.mrb[141].mxu0  ;;  %v2864_v34 = vmax.f32 %v2570_v23, 0.0  ;;  %v2574_v18 = vpop.f32.mrb[49].mxu1 }
 0x207   : > { %v2159_v30 = vadd.f32 %v5786_v8, %v2158_v57  ;;  %v4523_v41 = vpop.f32.mrb[142].mxu0  ;;  %v2862_v7 = vmax.f32 %v2562_v22, 0.0 }
 0x208   : > { %v2170_v3 = vadd.f32 %v5786_v8, %v4523_v41  ;;  %v2161_v21 = vpop.f32.mrb[143].mxu0  ;;  %v2763_v11 = vmax.f32 %v2167_v26, 0.0  ;;  %v5968_v60 = vpack.c.bf16 %v2864_v34, %v2863_v17  ;;  %v2583_v41 = vadd.f32 %v5786_v8, %v4626_v15 }
 0x209   : > { %v2162_v38 = vadd.f32 %v5786_v8, %v2161_v21  ;;  %v2761_v25 = vmax.f32 %v2159_v30, 0.0  ;;  %v5972_v21 = vpack.c.bf16 %v2862_v7, %v2861_v63 }
 0x20a   : > { %v2764_v16 = vmax.f32 %v2170_v3, 0.0  ;;  %v2867_v17 = vmax.f32 %v2583_v41, 0.0 }
 0x20b   : > { %v2762_v28 = vmax.f32 %v2162_v38, 0.0 }
 0x20c   : > { %v5963_v29 = vpack.c.bf16 %v2764_v16, %v2763_v11  ;;  %v2575_v11 = vadd.f32 %v5786_v8, %v2574_v18  ;;  %v4627_v16 = vpop.f32.mrb[50].mxu1 }
 0x20d   : > { %v5965_v42 = vpack.c.bf16 %v2762_v28, %v2761_v25  ;;  %v4526_v47 = vpop.f32.mrb[144].mxu0  ;;  %v2586_v25 = vadd.f32 %v5786_v8, %v4627_v16  ;;  %v2577_v28 = vpop.f32.mrb[51].mxu1 }
 0x20e   : > { %v2183_v26 = vadd.f32 %v5786_v8, %v4526_v47  ;;  %v2174_v57 = vpop.f32.mrb[145].mxu0  ;;  %v2865_v47 = vmax.f32 %v2575_v11, 0.0  ;;  %v2578_v63 = vadd.f32 %v5786_v8, %v2577_v28 }
 0x20f   : > { %v2175_v30 = vadd.f32 %v5786_v8, %v2174_v57  ;;  %v4527_v3 = vpop.f32.mrb[146].mxu0  ;;  %v2868_v15 = vmax.f32 %v2586_v25, 0.0 }
 0x210   : > { %v2186_v5 = vadd.f32 %v5786_v8, %v4527_v3  ;;  %v2177_v38 = vpop.f32.mrb[147].mxu0  ;;  %v2767_v23 = vmax.f32 %v2183_v26, 0.0  ;;  %v2866_v44 = vmax.f32 %v2578_v63, 0.0 }
 0x211   : > { %v2178_v10 = vadd.f32 %v5786_v8, %v2177_v38  ;;  %v2765_v22 = vmax.f32 %v2175_v30, 0.0  ;;  %v5980_v27 = vpack.c.bf16 %v2868_v15, %v2867_v17  ;;  %v4630_v30 = vpop.f32.mrb[52].mxu1 }
 0x212   : > { %v2768_v24 = vmax.f32 %v2186_v5, 0.0  ;;  %v5983_v5 = vpack.c.bf16 %v2866_v44, %v2865_v47  ;;  %v2599_v16 = vadd.f32 %v5786_v8, %v4630_v30 }
 0x213   : > { %v2766_v34 = vmax.f32 %v2178_v10, 0.0 }
 0x214   : > { %v4803_v7 = vpack.c.bf16 %v2768_v24, %v2767_v23  ;;  %v2590_v23 = vpop.f32.mrb[53].mxu1 }
 0x215   : > { %v4799_v57 = vpack.c.bf16 %v2766_v34, %v2765_v22  ;;  %v4530_v3 = vpop.f32.mrb[148].mxu0  ;;  %v2591_v17 = vadd.f32 %v5786_v8, %v2590_v23  ;;  %v4631_v25 = vpop.f32.mrb[54].mxu1  ;;  %v2871_v34 = vmax.f32 %v2599_v16, 0.0 }
 0x216   : > { %v2199_v38 = vadd.f32 %v5786_v8, %v4530_v3  ;;  %v2190_v18 = vpop.f32.mrb[149].mxu0  ;;  %v2602_v44 = vadd.f32 %v5786_v8, %v4631_v25  ;;  %v2593_v47 = vpop.f32.mrb[55].mxu1 }
 0x217   : > { %v2191_v26 = vadd.f32 %v5786_v8, %v2190_v18  ;;  %v4531_v41 = vpop.f32.mrb[150].mxu0  ;;  %4800 = vmatprep.subr.bf16.mxu1 %v4799_v57  ;;  %v2869_v57 = vmax.f32 %v2591_v17, 0.0 }
 0x218   : > { %v2202_v10 = vadd.f32 %v5786_v8, %v4531_v41  ;;  %v2193_v11 = vpop.f32.mrb[151].mxu0  ;;  %4802 = vmatpush3.bf16.msra.mxu1 %v5916_v0  ;;  %v2771_v28 = vmax.f32 %v2199_v38, 0.0  ;;  %v2594_v0 = vadd.f32 %v5786_v8, %v2593_v47  ;;  %v2872_v18 = vmax.f32 %v2602_v44, 0.0 }
 0x219   : > { %v2194_v24 = vadd.f32 %v5786_v8, %v2193_v11  ;;  %4804 = vmatprep.subr.bf16.mxu1 %v4803_v7  ;;  %v2769_v63 = vmax.f32 %v2191_v26, 0.0  ;;  %v4634_v11 = vpop.f32.mrb[56].mxu1 }
 0x21a   : > { %v2772_v22 = vmax.f32 %v2202_v10, 0.0  ;;  %v2870_v30 = vmax.f32 %v2594_v0, 0.0  ;;  %v5994_v16 = vpack.c.bf16 %v2872_v18, %v2871_v34  ;;  %v2615_v23 = vadd.f32 %v5786_v8, %v4634_v11 }
 0x21b   : > { %v2770_v15 = vmax.f32 %v2194_v24, 0.0 }
 0x21c   : > { %v4811_v3 = vpack.c.bf16 %v2772_v22, %v2771_v28  ;;  %4806 = vmatpush3.bf16.msra.mxu1 %v5910_v58  ;;  %v5998_v17 = vpack.c.bf16 %v2870_v30, %v2869_v57  ;;  %v2606_v28 = vpop.f32.mrb[57].mxu1 }
 0x21d   : > { %v4807_v41 = vpack.c.bf16 %v2770_v15, %v2769_v63  ;;  %v4534_v7 = vpop.f32.mrb[152].mxu0  ;;  %v2607_v34 = vadd.f32 %v5786_v8, %v2606_v28  ;;  %v4635_v44 = vpop.f32.mrb[58].mxu1  ;;  %v2875_v15 = vmax.f32 %v2615_v23, 0.0 }
 0x21e   : > { %v2215_v38 = vadd.f32 %v5786_v8, %v4534_v7  ;;  %v2206_v10 = vpop.f32.mrb[153].mxu0  ;;  %v2618_v0 = vadd.f32 %v5786_v8, %v4635_v44  ;;  %v2609_v18 = vpop.f32.mrb[59].mxu1 }
 0x21f   : > { %v2207_v26 = vadd.f32 %v5786_v8, %v2206_v10  ;;  %v4535_v24 = vpop.f32.mrb[154].mxu0  ;;  %4808 = vmatprep.subr.bf16.mxu1 %v4807_v41  ;;  %v2873_v7 = vmax.f32 %v2607_v34, 0.0  ;;  %v2610_v30 = vadd.f32 %v5786_v8, %v2609_v18 }
 0x220   : > { %v2218_v58 = vadd.f32 %v5786_v8, %v4535_v24  ;;  %v2209_v25 = vpop.f32.mrb[155].mxu0  ;;  %4810 = vmatpush3.bf16.msra.mxu1 %v5933_v19  ;;  %v2775_v47 = vmax.f32 %v2215_v38, 0.0  ;;  %v2876_v19 = vmax.f32 %v2618_v0, 0.0 }
 0x221   : > { %v2210_v22 = vadd.f32 %v5786_v8, %v2209_v25  ;;  %4812 = vmatprep.subr.bf16.mxu1 %v4811_v3  ;;  %v2773_v57 = vmax.f32 %v2207_v26, 0.0  ;;  %v2874_v24 = vmax.f32 %v2610_v30, 0.0  ;;  %v4109_v25 = vpop.f32.mrb[60].mxu1 }
 0x222   : > { %v2776_v63 = vmax.f32 %v2218_v58, 0.0  ;;  %v6008_v23 = vpack.c.bf16 %v2876_v19, %v2875_v15 }
 0x223   : > { %v2774_v41 = vmax.f32 %v2210_v22, 0.0  ;;  %v6011_v22 = vpack.c.bf16 %v2874_v24, %v2873_v7 }
 0x224   : > { %v4819_v11 = vpack.c.bf16 %v2776_v63, %v2775_v47  ;;  %4814 = vmatpush3.bf16.msra.mxu1 %v5931_v53  ;;  %v4110_v53 = vpop.f32.mrb[61].mxu1 }
 0x225   : > { %v4815_v10 = vpack.c.bf16 %v2774_v41, %v2773_v57  ;;  %v4538_v3 = vpop.f32.mrb[156].mxu0  ;;  %v6016_v63 = vadd.f32 %v4110_v53, %v4109_v25 }
 0x226   : > { %v2231_v38 = vadd.f32 %v5786_v8, %v4538_v3  ;;  %v2222_v58 = vpop.f32.mrb[157].mxu0 }
 0x227   : > { %v2223_v28 = vadd.f32 %v5786_v8, %v2222_v58  ;;  %v4539_v26 = vpop.f32.mrb[158].mxu0  ;;  %4816 = vmatprep.subr.bf16.mxu1 %v4815_v10 }
 0x228   : > { %v2234_v34 = vadd.f32 %v5786_v8, %v4539_v26  ;;  %v2225_v44 = vpop.f32.mrb[159].mxu0  ;;  %4818 = vmatpush3.bf16.msra.mxu1 %v5949_v14  ;;  %v2779_v0 = vmax.f32 %v2231_v38, 0.0  ;;  %v2916_v26 = vrot.slane %v5897_v36, %v2883_v51 }
 0x229   : > { %v2226_v47 = vadd.f32 %v5786_v8, %v2225_v44  ;;  %4820 = vmatprep.subr.bf16.mxu1 %v4819_v11  ;;  %v2777_v18 = vmax.f32 %v2223_v28, 0.0  ;;  %v2928_v44 = vrot.slane %v5897_v36, %v2895_v13 }
 0x22a   : > { %v2780_v15 = vmax.f32 %v2234_v34, 0.0 }
 0x22b   : > { %v2778_v57 = vmax.f32 %v2226_v47, 0.0 }
 0x22c   : > { %v4827_v41 = vpack.c.bf16 %v2780_v15, %v2779_v0  ;;  %4822 = vmatpush3.bf16.msra.mxu1 %v5947_v46 }
 0x22d   : > { %v4823_v7 = vpack.c.bf16 %v2778_v57, %v2777_v18  ;;  %v4542_v30 = vpop.f32.mrb[160].mxu0 }
 0x22e   : > { %v2247_v19 = vadd.f32 %v5786_v8, %v4542_v30  ;;  %v2238_v10 = vpop.f32.mrb[161].mxu0 }
 0x22f   : > { %v2239_v14 = vadd.f32 %v5786_v8, %v2238_v10  ;;  %v4543_v3 = vpop.f32.mrb[162].mxu0  ;;  %4824 = vmatprep.subr.bf16.mxu1 %v4823_v7 }
 0x230   : > { %v2250_v11 = vadd.f32 %v5786_v8, %v4543_v3  ;;  %v2241_v24 = vpop.f32.mrb[163].mxu0  ;;  %4826 = vmatpush3.bf16.msra.mxu1 %v5965_v42  ;;  %v2783_v38 = vmax.f32 %v2247_v19, 0.0 }
 0x231   : > { %v2242_v25 = vadd.f32 %v5786_v8, %v2241_v24  ;;  %4828 = vmatprep.subr.bf16.mxu1 %v4827_v41  ;;  %v2781_v46 = vmax.f32 %v2239_v14, 0.0 }
 0x232   : > { %v2784_v58 = vmax.f32 %v2250_v11, 0.0 }
 0x233   : > { %v2782_v28 = vmax.f32 %v2242_v25, 0.0 }
 0x234   : > { %v6027_v34 = vpack.c.bf16 %v2784_v58, %v2783_v38  ;;  %4830 = vmatpush3.bf16.msra.mxu1 %v5963_v29 }
 0x235   : > { %v6033_v42 = vpack.c.bf16 %v2782_v28, %v2781_v46  ;;  %v4546_v53 = vpop.f32.mrb[164].mxu0 }
 0x236   : > { %v2263_v47 = vadd.f32 %v5786_v8, %v4546_v53  ;;  %v2254_v0 = vpop.f32.mrb[165].mxu0 }
 0x237   : > { %v2255_v15 = vadd.f32 %v5786_v8, %v2254_v0  ;;  %v4547_v18 = vpop.f32.mrb[166].mxu0  ;;  %3306 = vmatmul.mubr.f32.vlgmr.msra.gmra.mrb[68].mxu1 %v2916_v26 }
 0x238   : > { %v2266_v51 = vadd.f32 %v5786_v8, %v4547_v18  ;;  %v2257_v57 = vpop.f32.mrb[167].mxu0  ;;  %3375 = vmatprep.mubr.f32.mxu1 %v2928_v44  ;;  %v2787_v41 = vmax.f32 %v2263_v47, 0.0 }
 0x239   : > { %v2258_v29 = vadd.f32 %v5786_v8, %v2257_v57  ;;  %v2785_v30 = vmax.f32 %v2255_v15, 0.0 }
 0x23a   : > { %v2788_v7 = vmax.f32 %v2266_v51, 0.0 }
 0x23b   : > { %v2786_v13 = vmax.f32 %v2258_v29, 0.0 }
 0x23c   : > { %v6039_v19 = vpack.c.bf16 %v2788_v7, %v2787_v41 }
 0x23d   : > { %v6041_v10 = vpack.c.bf16 %v2786_v13, %v2785_v30  ;;  %v4550_v14 = vpop.f32.mrb[168].mxu0 }
 0x23e   : > { %v2279_v3 = vadd.f32 %v5786_v8, %v4550_v14  ;;  %v2270_v11 = vpop.f32.mrb[169].mxu0 }
 0x23f   : > { %v2271_v24 = vadd.f32 %v5786_v8, %v2270_v11  ;;  %v4551_v25 = vpop.f32.mrb[170].mxu0 }
 0x240   : > { %v2282_v38 = vadd.f32 %v5786_v8, %v4551_v25  ;;  %v2273_v58 = vpop.f32.mrb[171].mxu0  ;;  %v2791_v28 = vmax.f32 %v2279_v3, 0.0 }
 0x241   : > { %v2274_v46 = vadd.f32 %v5786_v8, %v2273_v58  ;;  %v2789_v44 = vmax.f32 %v2271_v24, 0.0 }
 0x242   : > { %v2792_v26 = vmax.f32 %v2282_v38, 0.0 }
 0x243   : > { %v2790_v53 = vmax.f32 %v2274_v46, 0.0 }
 0x244   : > { %v6047_v47 = vpack.c.bf16 %v2792_v26, %v2791_v28  ;;  %v6062_v26 = vld [vmem:[%s6241_s2] ss:$0 sm:$0xff] }
 0x245   : > { %v6049_v0 = vpack.c.bf16 %v2790_v53, %v2789_v44  ;;  %v4554_v15 = vpop.f32.mrb[172].mxu0 }
 0x246   : > { %v2295_v18 = vadd.f32 %v5786_v8, %v4554_v15  ;;  %v2286_v51 = vpop.f32.mrb[173].mxu0 }
 0x247   : > { %v2287_v57 = vadd.f32 %v5786_v8, %v2286_v51  ;;  %v4555_v29 = vpop.f32.mrb[174].mxu0 }
 0x248   : > { %v2298_v41 = vadd.f32 %v5786_v8, %v4555_v29  ;;  %v2289_v7 = vpop.f32.mrb[175].mxu0  ;;  %v2795_v13 = vmax.f32 %v2295_v18, 0.0 }
 0x249   : > { %v2290_v30 = vadd.f32 %v5786_v8, %v2289_v7  ;;  %v2793_v11 = vmax.f32 %v2287_v57, 0.0 }
 0x24a   : > { %v2796_v14 = vmax.f32 %v2298_v41, 0.0  ;;  %v4144_v3 = vpop.f32.mrb[62].mxu1 }
 0x24b   : > { %v2794_v24 = vmax.f32 %v2290_v30, 0.0  ;;  %v4145_v25 = vpop.f32.mrb[63].mxu1 }
 0x24c   : > { %v6055_v38 = vpack.c.bf16 %v2796_v14, %v2795_v13  ;;  %v4146_v58 = vadd.f32 %v4145_v25, %v4144_v3 }
 0x24d   : > { %v6057_v46 = vpack.c.bf16 %v2794_v24, %v2793_v11  ;;  %v4558_v28 = vpop.f32.mrb[176].mxu0 }
 0x24e   : > { %v2311_v44 = vadd.f32 %v6062_v26, %v4558_v28  ;;  %v2302_v8 = vpop.f32.mrb[177].mxu0  ;;  %v6066_v53 = vadd.f32 %v4146_v58, %v6016_v63 }
 0x24f   : > { %v2303_v15 = vadd.f32 %v6062_v26, %v2302_v8  ;;  %v4559_v18 = vpop.f32.mrb[178].mxu0 }
 0x250   : > { %v2314_v51 = vadd.f32 %v6062_v26, %v4559_v18  ;;  %v2305_v57 = vpop.f32.mrb[179].mxu0  ;;  %v2799_v41 = vmax.f32 %v2311_v44, 0.0 }
 0x251   : > { %v2306_v29 = vadd.f32 %v6062_v26, %v2305_v57  ;;  %v2797_v30 = vmax.f32 %v2303_v15, 0.0 }
 0x252   : > { %v2800_v7 = vmax.f32 %v2314_v51, 0.0 }
 0x253   : > { %v2798_v13 = vmax.f32 %v2306_v29, 0.0 }
 0x254   : > { %v4835_v14 = vpack.c.bf16 %v2800_v7, %v2799_v41 }
 0x255   : > { %v4831_v3 = vpack.c.bf16 %v2798_v13, %v2797_v30  ;;  %v4562_v11 = vpop.f32.mrb[180].mxu0 }
 0x256   : > { %v2327_v24 = vadd.f32 %v6062_v26, %v4562_v11  ;;  %v2318_v25 = vpop.f32.mrb[181].mxu0 }
 0x257   : > { %v2319_v63 = vadd.f32 %v6062_v26, %v2318_v25  ;;  %v4563_v58 = vpop.f32.mrb[182].mxu0  ;;  %4832 = vmatprep.subr.bf16.mxu1 %v4831_v3 }
 0x258   : > { %v2330_v28 = vadd.f32 %v6062_v26, %v4563_v58  ;;  %v2321_v8 = vpop.f32.mrb[183].mxu0  ;;  %4834 = vmatpush3.bf16.msra.mxu1 %v6033_v42  ;;  %v2803_v15 = vmax.f32 %v2327_v24, 0.0 }
 0x259   : > { %v2322_v44 = vadd.f32 %v6062_v26, %v2321_v8  ;;  %4836 = vmatprep.subr.bf16.mxu1 %v4835_v14  ;;  %v2801_v51 = vmax.f32 %v2319_v63, 0.0 }
 0x25a   : > { %v2804_v18 = vmax.f32 %v2330_v28, 0.0 }
 0x25b   : > { %v2802_v57 = vmax.f32 %v2322_v44, 0.0 }
 0x25c   : > { %v4843_v29 = vpack.c.bf16 %v2804_v18, %v2803_v15  ;;  %4838 = vmatpush3.bf16.msra.mxu1 %v6027_v34 }
 0x25d   : > { %v4839_v41 = vpack.c.bf16 %v2802_v57, %v2801_v51  ;;  %v4566_v7 = vpop.f32.mrb[184].mxu0 }
 0x25e   : > { %v2343_v30 = vadd.f32 %v6062_v26, %v4566_v7  ;;  %v2334_v13 = vpop.f32.mrb[185].mxu0 }
 0x25f   : > { %v2335_v3 = vadd.f32 %v6062_v26, %v2334_v13  ;;  %v4567_v11 = vpop.f32.mrb[186].mxu0  ;;  %4840 = vmatprep.subr.bf16.mxu1 %v4839_v41 }
 0x260   : > { %v2346_v42 = vadd.f32 %v6062_v26, %v4567_v11  ;;  %v2337_v25 = vpop.f32.mrb[187].mxu0  ;;  %4842 = vmatpush3.bf16.msra.mxu1 %v6041_v10  ;;  %v2807_v24 = vmax.f32 %v2343_v30, 0.0 }
 0x261   : > { %v2338_v14 = vadd.f32 %v6062_v26, %v2337_v25  ;;  %4844 = vmatprep.subr.bf16.mxu1 %v4843_v29  ;;  %v2805_v34 = vmax.f32 %v2335_v3, 0.0 }
 0x262   : > { %v2808_v63 = vmax.f32 %v2346_v42, 0.0 }
 0x263   : > { %v2806_v58 = vmax.f32 %v2338_v14, 0.0 }
 0x264   : > { %v4851_v28 = vpack.c.bf16 %v2808_v63, %v2807_v24  ;;  %4846 = vmatpush3.bf16.msra.mxu1 %v6039_v19 }
 0x265   : > { %v4847_v8 = vpack.c.bf16 %v2806_v58, %v2805_v34  ;;  %v4570_v44 = vpop.f32.mrb[188].mxu0 }
 0x266   : > { %v2359_v15 = vadd.f32 %v6062_v26, %v4570_v44  ;;  %v2350_v18 = vpop.f32.mrb[189].mxu0 }
 0x267   : > { %v2351_v51 = vadd.f32 %v6062_v26, %v2350_v18  ;;  %v4571_v57 = vpop.f32.mrb[190].mxu0  ;;  %4848 = vmatprep.subr.bf16.mxu1 %v4847_v8 }
 0x268   : > { %v2362_v10 = vadd.f32 %v6062_v26, %v4571_v57  ;;  %v2353_v41 = vpop.f32.mrb[191].mxu0  ;;  %4850 = vmatpush3.bf16.msra.mxu1 %v6049_v0  ;;  %v2811_v7 = vmax.f32 %v2359_v15, 0.0  ;;  %v2924_v15 = vrot.slane %v5897_v36, %v2891_v33 }
 0x269   : > { %v2354_v29 = vadd.f32 %v6062_v26, %v2353_v41  ;;  %4852 = vmatprep.subr.bf16.mxu1 %v4851_v28  ;;  %v2809_v19 = vmax.f32 %v2351_v51, 0.0  ;;  %v2936_v51 = vrot.slane %v5897_v36, %v2903_v32 }
 0x26a   : > { %v2812_v30 = vmax.f32 %v2362_v10, 0.0 }
 0x26b   : > { %v2810_v13 = vmax.f32 %v2354_v29, 0.0 }
 0x26c   : > { %v4859_v3 = vpack.c.bf16 %v2812_v30, %v2811_v7  ;;  %4854 = vmatpush3.bf16.msra.mxu1 %v6047_v47  ;;  %v5201_v7 = vmov 0.0  }
 0x26d   : > { %v4855_v11 = vpack.c.bf16 %v2810_v13, %v2809_v19  ;;  %v4574_v42 = vpop.f32.mrb[192].mxu0 }
 0x26e   : > { %v2375_v25 = vadd.f32 %v6062_v26, %v4574_v42  ;;  %v2366_v14 = vpop.f32.mrb[193].mxu0 }
 0x26f   : > { %v2367_v24 = vadd.f32 %v6062_v26, %v2366_v14  ;;  %v4575_v63 = vpop.f32.mrb[194].mxu0  ;;  %4856 = vmatprep.subr.bf16.mxu1 %v4855_v11 }
 0x270   : > { %v2815_v0 = vmax.f32 %v2375_v25, 0.0  ;;  %v2378_v34 = vadd.f32 %v6062_v26, %v4575_v63  ;;  %v2369_v58 = vpop.f32.mrb[195].mxu0  ;;  %4858 = vmatpush3.bf16.msra.mxu1 %v6057_v46  ;;  %v3535_v46 = vld [vmem:[%s6243_s4 + $0x70] sm:$0xff] }
 0x271   : > { %v2370_v28 = vadd.f32 %v6062_v26, %v2369_v58  ;;  %4860 = vmatprep.subr.bf16.mxu1 %v4859_v3  ;;  %v2813_v47 = vmax.f32 %v2367_v24, 0.0  ;;  %v3536_v26 = vld [vmem:[%s6243_s4 + $0x78] sm:$0xff]  ;;  %v3537_v58 = vld [vmem:[%s6244_s5] sm:$0x1] }
 0x272   : > { %v2816_v8 = vmax.f32 %v2378_v34, 0.0  ;;  %v4949_v10 = vpack.c.bf16 %v3536_v26, %v3535_v46 }
 0x273   : > { %v2814_v44 = vmax.f32 %v2370_v28, 0.0 }
 0x274   : > { %v4869_v18 = vpack.c.bf16 %v2816_v8, %v2815_v0  ;;  %4862 = vmatpush3.bf16.msra.mxu1 %v6055_v38 }
 0x275   : > { %v4865_v57 = vpack.c.bf16 %v2814_v44, %v2813_v47  ;;  %4864 = vmatprep.subr.bf16.mxu1 %v5841_v48 }
 0x277   : > { %3376 = vmatmul.mubr.f32.vlgmr.msra.gmra.mrb[70].mxu1 %v2924_v15 }
 0x278   : > { %4866 = vmatpush3.bf16.msra.mxu1 %v4865_v57  ;;  %3445 = vmatprep.mubr.f32.mxu1 %v2936_v51 }
 0x279   : > { %4868 = vmatprep.subr.bf16.mxu1 %v5838_v43 }
 0x27c   : > { %4870 = vmatpush3.bf16.msra.mxu1 %v4869_v18 }
 0x27d   : > { %4872 = vmatprep.subr.bf16.mxu1 %v5854_v55  ;;  %v3521_v55 = vld [vmem:[%s6243_s4] sm:$0xff] }
 0x280   : > { %4874 = vmatpush3.bf16.msra.mxu1 %v5793_v1  ;;  %v6250_v1 = vsub.s32 7, %v5457_v20 }
 0x281   : > { %4876 = vmatprep.subr.bf16.mxu1 %v5851_v62 }
 0x284   : > { %4878 = vmatpush3.bf16.msra.mxu1 %v5790_v52  ;;  %v2932_v52 = vrot.slane %v5897_v36, %v2899_v56  ;;  %v6251_v56 = vsub.s32 6, %v5457_v20  ;;  %v3523_v20 = vld [vmem:[%s6243_s4 + $0x10] sm:$0xff] }
 0x285   : > { %4880 = vmatprep.subr.bf16.mxu1 %v5868_v9  ;;  %v5199_v9 = vmov 0.0|0.0  }
 0x288   : > { %4882 = vmatpush3.bf16.msra.mxu1 %v5809_v31  ;;  %v2944_v31 = vrot.slane %v5897_v36, %v6250_v1 }
 0x289   : > { %4884 = vmatprep.subr.bf16.mxu1 %v5865_v4  ;;  %v3522_v4 = vld [vmem:[%s6243_s4 + $0x8] sm:$0xff] }
 0x28a   : > { %v4179_v33 = vpop.f32.mrb[64].mxu1 }
 0x28b   : > { %v4180_v32 = vpop.f32.mrb[65].mxu1 }
 0x28c   : > { %4886 = vmatpush3.bf16.msra.mxu1 %v5806_v50  ;;  %v4181_v43 = vadd.f32 %v4180_v32, %v4179_v33 }
 0x28d   : > { %4888 = vmatprep.subr.bf16.mxu1 %v5882_v12  ;;  %v3524_v12 = vld [vmem:[%s6243_s4 + $0x18] sm:$0xff] }
 0x28e   : > { %v3168_v48 = vadd.f32 %v4181_v43, %v6066_v53 }
 0x290   : > { %4890 = vmatpush3.bf16.msra.mxu1 %v5825_v6 }
 0x291   : > { %4892 = vmatprep.subr.bf16.mxu1 %v5879_v54  ;;  %v4928_v54 = vpack.c.bf16 %v3522_v4, %v3521_v55 }
 0x294   : > { %4894 = vmatpush3.bf16.msra.mxu1 %v5822_v35 }
 0x295   : > { %4896 = vmatprep.subr.bf16.mxu1 %v5972_v21  ;;  %v3531_v21 = vld [vmem:[%s6243_s4 + $0x50] sm:$0xff] }
 0x297   : > { %3446 = vmatmul.mubr.f32.vlgmr.msra.gmra.mrb[72].mxu1 %v2932_v52 }
 0x298   : > { %4898 = vmatpush3.bf16.msra.mxu1 %v5902_v40  ;;  %3515 = vmatprep.mubr.f32.mxu1 %v2944_v31  ;;  %v3526_v40 = vld [vmem:[%s6243_s4 + $0x28] sm:$0xff] }
 0x299   : > { %4900 = vmatprep.subr.bf16.mxu1 %v5968_v60 }
 0x29c   : > { %4902 = vmatpush3.bf16.msra.mxu1 %v5899_v37  ;;  %v3525_v37 = vld [vmem:[%s6243_s4 + $0x20] sm:$0xff] }
 0x29d   : > { %4904 = vmatprep.subr.bf16.mxu1 %v5983_v5  ;;  %v3532_v5 = vld [vmem:[%s6243_s4 + $0x58] sm:$0xff] }
 0x2a0   : > { %4906 = vmatpush3.bf16.msra.mxu1 %v5926_v61  ;;  %v3527_v61 = vld [vmem:[%s6243_s4 + $0x30] sm:$0xff] }
 0x2a1   : > { %4908 = vmatprep.subr.bf16.mxu1 %v5980_v27  ;;  %v2940_v27 = vrot.slane %v5897_v36, %v6251_v56  ;;  %v4931_v36 = vpack.c.bf16 %v3524_v12, %v3523_v20 }
 0x2a4   : > { %4910 = vmatpush3.bf16.msra.mxu1 %v5922_v45  ;;  %v4934_v45 = vpack.c.bf16 %v3526_v40, %v3525_v37 }
 0x2a5   : > { %4912 = vmatprep.subr.bf16.mxu1 %v5998_v17  ;;  %v3533_v17 = vld [vmem:[%s6243_s4 + $0x60] sm:$0xff] }
 0x2a8   : > { %4914 = vmatpush3.bf16.msra.mxu1 %v5940_v49 }
 0x2a9   : > { %4916 = vmatprep.subr.bf16.mxu1 %v5994_v16  ;;  %v4943_v16 = vpack.c.bf16 %v3532_v5, %v3531_v21 }
 0x2ac   : > { %4918 = vmatpush3.bf16.msra.mxu1 %v5936_v39  ;;  %v3528_v39 = vld [vmem:[%s6243_s4 + $0x38] sm:$0xff] }
 0x2ad   : > { %4920 = vmatprep.subr.bf16.mxu1 %v6011_v22  ;;  %v4937_v49 = vpack.c.bf16 %v3528_v39, %v3527_v61 }
 0x2b0   : > { %4922 = vmatpush3.bf16.msra.mxu1 %v5956_v2  ;;  %v3530_v2 = vld [vmem:[%s6243_s4 + $0x48] sm:$0xff] }
 0x2b1   : > { %4924 = vmatprep.subr.bf16.mxu1 %v6008_v23  ;;  %v3534_v23 = vld [vmem:[%s6243_s4 + $0x68] sm:$0xff] }
 0x2b2   : > { %v4946_v22 = vpack.c.bf16 %v3534_v23, %v3533_v17 }
 0x2b4   : > { %4926 = vmatpush3.bf16.msra.mxu1 %v5952_v59  ;;  %v3529_v59 = vld [vmem:[%s6243_s4 + $0x40] sm:$0xff] }
 0x2b5   : > { %4927 = vmatprep.subr.bf16.mxu1 %v5199_v9  ;;  %v4940_v60 = vpack.c.bf16 %v3530_v2, %v3529_v59 }
 0x2b7   : > { %3516 = vmatmul.mubr.f32.vlgmr.msra.gmra.mrb[74].mxu1 %v2940_v27 }
 0x2b8   : > { %4929 = vmatpush3.bf16.msra.mxu1 %v4928_v54  ;;  %4668 = vmatprep.mubr.msk.f32.mxu1 %vm5200_vm2, %v5201_v7 }
 0x2b9   : > { %4930 = vmatprep.subr.bf16.mxu1 %v5199_v9 }
 0x2bc   : > { %4932 = vmatpush3.bf16.msra.mxu1 %v4931_v36 }
 0x2bd   : > { %4933 = vmatprep.subr.bf16.mxu1 %v5199_v9 }
 0x2c0   : > { %4935 = vmatpush3.bf16.msra.mxu1 %v4934_v45 }
 0x2c1   : > { %4936 = vmatprep.subr.bf16.mxu1 %v5199_v9 }
 0x2c4   : > { %4938 = vmatpush3.bf16.msra.mxu1 %v4937_v49 }
 0x2c5   : > { %4939 = vmatprep.subr.bf16.mxu1 %v5199_v9 }
 0x2c8   : > { %4941 = vmatpush3.bf16.msra.mxu1 %v4940_v60 }
 0x2c9   : > { %4942 = vmatprep.subr.bf16.mxu1 %v5199_v9 }
 0x2ca   : > { %v4214_v50 = vpop.f32.mrb[66].mxu1 }
 0x2cb   : > { %v4215_v35 = vpop.f32.mrb[67].mxu1 }
 0x2cc   : > { %v4216_v6 = vadd.f32 %v4215_v35, %v4214_v50  ;;  %4944 = vmatpush3.bf16.msra.mxu1 %v4943_v16 }
 0x2cd   : > { %4945 = vmatprep.subr.bf16.mxu1 %v5199_v9 }
 0x2ce   : > { %v3238_v62 = vadd.f32 %v4216_v6, %v3168_v48 }
 0x2d0   : > { %4947 = vmatpush3.bf16.msra.mxu1 %v4946_v22 }
 0x2d1   : > { %4948 = vmatprep.subr.bf16.mxu1 %v5199_v9 }
 0x2d4   : > { %4950 = vmatpush3.bf16.msra.mxu1 %v4949_v10 }
 0x30a   : > { %v4249_v38 = vpop.f32.mrb[68].mxu1 }
 0x30b   : > { %v4250_v53 = vpop.f32.mrb[69].mxu1 }
 0x30c   : > { %v4251_v41 = vadd.f32 %v4250_v53, %v4249_v38 }
 0x30e   : > { %v3308_v29 = vadd.f32 %v4251_v41, %v3238_v62 }
 0x34a   : > { %v4284_v30 = vpop.f32.mrb[70].mxu1 }
 0x34b   : > { %v4285_v19 = vpop.f32.mrb[71].mxu1 }
 0x34c   : > { %v4286_v13 = vadd.f32 %v4285_v19, %v4284_v30 }
 0x34e   : > { %v3378_v3 = vadd.f32 %v4286_v13, %v3308_v29 }
 0x36a   : > { %v4319_v11 = vpop.f32.mrb[72].mxu1 }
 0x36b   : > { %v4320_v42 = vpop.f32.mrb[73].mxu1 }
 0x36c   : > { %v4321_v25 = vadd.f32 %v4320_v42, %v4319_v11 }
 0x36e   : > { %v3448_v14 = vadd.f32 %v4321_v25, %v3378_v3 }
 0x38a   : > { %v4354_v24 = vpop.f32.mrb[74].mxu1 }
 0x38b   : > { %v4355_v63 = vpop.f32.mrb[75].mxu1 }
 0x38c   : > { %v4356_v0 = vadd.f32 %v4355_v63, %v4354_v24 }
 0x38e   : > { %v3518_v34 = vadd.f32 %v4356_v0, %v3448_v14 }
 0x390   : > { %4669 = vmatmul.mubr.f32.vlgmr.msra.gmra.mrb[76].mxu1 %v3518_v34 }
 0x463   : > { %v3604_v28 = vpop.f32.mrb[76].mxu1 }
 0x464   : > { %v3605_v8 = vadd.f32 %v3604_v28, %v3537_v58  ;;  %v4670_v47 = vpop.f32.mrb[77].mxu1 }
 0x466   : > { %3608 = vst [vmem:[%s244_s29] sm:$0x1] %v3605_v8 }
 0x467   : > { %5148 = shalt.err (!%p5145_p3)
}
 0x468   : > { %s5149_s17 = scalar_lea.hbm %s6197_s12, 16  ;;  %s5153_s20 = scalar_lea.hbm %s6245_s6, 32 }
 0x469   : > { %p5150_p4 = scmp.ne.s32.totalorder %s6197_s12, %s5149_s17  ;;  %p5154_p9 = scmp.lt.u32.totalorder %s6197_s12, %s6245_s6 }
 0x46a   : > { %p5155_p10 = scmp.lt.u32.totalorder %s5153_s20, %s5149_s17  ;;  %p5157_p12 = scmp.lt.u32.totalorder %s5149_s17, %s6197_s12 }
 0x46b   : > { %p5151_p7 = pnand %p5150_p4, %p5276_p5 }
 0x46c   : > { %p5156_p11 = por %p5155_p10, %p5154_p9 }
 0x46d   : > { %p5152_p8 = pneg %p5151_p7 }
 0x46e   : > { %p5158_p13 = por %p5157_p12, %p5156_p11 }
 0x470   : > { %p5159_p0 = pnand %p5158_p13, %p5152_p8 }
 0x472   : > { %5162 = shalt.err (!%p5159_p0)
}
 0x473   : > { %4959 = dma.vmem_to_hbm [thread:$0]  (%p5276_p5), %s6199_s9, 16, %s6197_s12, %s3610_s13  }
 0x474 PF: > { %p4965_p1 = scmp.ge.s32.totalorder %s5197_s24, 2  ;;  %s3634_s29 = sand.u32 1, %s5185_s21  }
 0x475   : > { %s3635_s10 = scalar_lea.sflag [#allocation3], %s3634_s29 }
 0x476   : > { %p4962_p2 = pnand %p4965_p1, %p5280_p6 }
 0x478   : > { %5180 = dma.done.wait (!%p4962_p2), %s3635_s10, 16  }
 0x479   : > { %5182 = vsyncadd (!%p4962_p2), %s3635_s10, 4294967280  ;;  %p16_p3 = scmp.ge.s32.totalorder %s5263_s27, 4   ;;  %s6252_s21 = smov %s5189_s22 }
 0x47a   : > { %s6253_s22 = smov %s5193_s23  ;;  %s6254_s23 = smov %s5274_s30 }
 0x47b   : > { %s6255_s24 = smov %s5263_s27  ;;  %18 = sbr.rel (!%p16_p3) target bundleno = 3 (0x3), region = 79 }
 0x482   :  { %3639 = vsyncpa [#allocation3], 1 }
 0x483   :  { %3641 = vsyncpa [#allocation3 + $0x1], 1 }

</bundles_post_ra>
